<compile_context>
chip_gen: v7x
topology: tpu7x:2x2x1
jax: 0.10.0
libtpu: 0.0.40
codegen_flags: <defaults>
</compile_context>

<pallas_src>
import functools

import jax
import jax.numpy as jnp
from jax.experimental import pallas as pl
from jax.experimental.pallas import tpu as pltpu


def _round_up(x: int, m: int) -> int:
    return (x + m - 1) // m * m


def _score(h, t, r, w, l1_flag):
    # proj(h, w) + r - proj(t, w) == (h - t) + r - <h - t, w> * w
    d = h - t
    diff = d + r - jnp.sum(d * w, axis=1, keepdims=True) * w
    if l1_flag:
        return jnp.sum(jnp.abs(diff), axis=1)
    return jnp.sum(diff * diff, axis=1)


# ----------------------------------------------------------------------------
# Kernel A: relation+normal table resident in VMEM, gathered via one-hot MXU
# matmul (overlaps the entity-row DMAs).  4 DMA descriptors per batch element.
# ----------------------------------------------------------------------------
def _transh_kernel_relvmem(
    # scalar-prefetch entity index refs (SMEM), each [B_pad] int32
    ph_idx, pt_idx, nh_idx, nt_idx,
    # inputs
    ent_hbm,          # entity table, left in HBM (memory_space=pl.ANY)
    relnorm_ref,      # [R_pad, 2D] rel||norm table, VMEM block
    pr_ref, nr_ref,   # [tb, 1] int32 relation indices, VMEM blocks
    # outputs: lane-dense (1, tb) blocks of the [num_tiles, tb] score slabs
    pos_ref, neg_ref,
    # scratch: 4 gathered entity-row buffers [tb, D] + per-buffer DMA sems
    ph_b, pt_b, nh_b, nt_b, sem,
    *, tb: int, d: int, r_pad: int, l1_flag: bool):

    base = pl.program_id(0) * tb
    ent_gathers = ((ph_idx, ph_b), (pt_idx, pt_b), (nh_idx, nh_b), (nt_idx, nt_b))

    # Issue every entity row-gather DMA for this tile.
    @pl.loop(0, tb)
    def _issue(j):
        for k, (idx_ref, buf) in enumerate(ent_gathers):
            row = idx_ref[base + j]
            pltpu.make_async_copy(
                ent_hbm.at[pl.ds(row, 1), :],
                buf.at[pl.ds(j, 1), :],
                sem.at[k],
            ).start()

    # Gather relation + normal rows with a one-hot matmul on the MXU while the
    # entity DMAs are in flight.
    table = relnorm_ref[...]
    iota_r = jax.lax.broadcasted_iota(jnp.int32, (tb, r_pad), 1)
    p_onehot = (pr_ref[...] == iota_r).astype(jnp.float32)
    n_onehot = (nr_ref[...] == iota_r).astype(jnp.float32)
    prn = jnp.dot(p_onehot, table, preferred_element_type=jnp.float32)
    nrn = jnp.dot(n_onehot, table, preferred_element_type=jnp.float32)

    # One full-buffer wait per entity gather buffer (byte counts match: each
    # buffer received exactly tb rows of D f32).
    for k, (_idx, buf) in enumerate(ent_gathers):
        pltpu.make_async_copy(buf, buf, sem.at[k]).wait()

    pos = _score(ph_b[...], pt_b[...], prn[:, :d], prn[:, d:], l1_flag)
    neg = _score(nh_b[...], nt_b[...], nrn[:, :d], nrn[:, d:], l1_flag)
    pos_ref[...] = pos.reshape(1, tb)
    neg_ref[...] = neg.reshape(1, tb)


# ----------------------------------------------------------------------------
# Kernel B (fallback for very large relation tables): relation+normal rows are
# DMA-gathered from the concatenated HBM table.  6 descriptors per element.
# ----------------------------------------------------------------------------
def _transh_kernel_reldma(
    ph_idx, pt_idx, nh_idx, nt_idx, pr_idx, nr_idx,       # scalar prefetch (SMEM)
    ent_hbm, relnorm_hbm,                                  # HBM tables (pl.ANY)
    pos_ref, neg_ref,                                      # outputs
    ph_b, pt_b, nh_b, nt_b, prn_b, nrn_b, sem,             # scratch
    *, tb: int, d: int, l1_flag: bool):

    base = pl.program_id(0) * tb
    gathers = (
        (ent_hbm, ph_idx, ph_b), (ent_hbm, pt_idx, pt_b),
        (ent_hbm, nh_idx, nh_b), (ent_hbm, nt_idx, nt_b),
        (relnorm_hbm, pr_idx, prn_b), (relnorm_hbm, nr_idx, nrn_b),
    )

    @pl.loop(0, tb)
    def _issue(j):
        for k, (tbl, idx_ref, buf) in enumerate(gathers):
            row = idx_ref[base + j]
            pltpu.make_async_copy(
                tbl.at[pl.ds(row, 1), :],
                buf.at[pl.ds(j, 1), :],
                sem.at[k],
            ).start()

    for k, (_tbl, _idx, buf) in enumerate(gathers):
        pltpu.make_async_copy(buf, buf, sem.at[k]).wait()

    prn = prn_b[...]
    nrn = nrn_b[...]
    pos = _score(ph_b[...], pt_b[...], prn[:, :d], prn[:, d:], l1_flag)
    neg = _score(nh_b[...], nt_b[...], nrn[:, :d], nrn[:, d:], l1_flag)
    pos_ref[...] = pos.reshape(1, tb)
    neg_ref[...] = neg.reshape(1, tb)


def build_relnorm(rel_emb, norm_emb):
    """Concatenate rel||norm along columns and pad rows to a multiple of 128."""
    r, _ = rel_emb.shape
    r_pad = _round_up(r, 128)
    relnorm = jnp.concatenate([rel_emb, norm_emb], axis=1)
    return jnp.pad(relnorm, ((0, r_pad - r), (0, 0)))


def transh_scores(ent_emb, relnorm_emb,
                  pos_h, pos_t, pos_r, neg_h, neg_t, neg_r,
                  *, l1_flag: bool, tb: int | None = None,
                  rel_table_vmem_max_bytes: int = 2 * 1024 * 1024):
    """ent_emb: [E, D] f32 (D multiple of 128). relnorm_emb: [R_pad, 2D] f32
    (rows padded to multiple of 128). Index vectors: [B] int32.
    Returns (pos, neg), each [B] float32."""
    _, D = ent_emb.shape
    R_pad, two_d = relnorm_emb.shape
    assert D % 128 == 0, "embedding dim must be padded to a multiple of 128"
    assert two_d == 2 * D and R_pad % 128 == 0
    assert ent_emb.dtype == jnp.float32 and relnorm_emb.dtype == jnp.float32
    B = pos_h.shape[0]

    rel_vmem = (R_pad * two_d * 4) <= rel_table_vmem_max_bytes

    if tb is None:
        # Per-row f32 working set: 4 entity gather buffers + rel/norm rows +
        # compute temporaries (+ the two one-hot matrices on the VMEM path).
        per_row_floats = 20 * D + (2 * R_pad if rel_vmem else 4 * D)
        budget = 6 * 1024 * 1024   # bytes; safe under v5e 16 MiB scoped VMEM
        tb = (budget // (per_row_floats * 4)) // 128 * 128
        tb = max(128, min(512, tb))
    else:
        tb = max(128, (tb // 128) * 128)
    tb = min(tb, _round_up(B, 128))          # don't over-pad tiny batches
    B_pad = _round_up(B, tb)
    num_tiles = B_pad // tb

    def pad_idx(idx):
        idx = jnp.asarray(idx, jnp.int32)
        return jnp.pad(idx, (0, B_pad - B))

    ph, pt, pr, nh, nt, nr = map(pad_idx, (pos_h, pos_t, pos_r, neg_h, neg_t, neg_r))

    out_shapes = (jax.ShapeDtypeStruct((num_tiles, tb), jnp.float32),
                  jax.ShapeDtypeStruct((num_tiles, tb), jnp.float32))
    out_spec = pl.BlockSpec((1, tb), lambda i, *_: (i, 0))
    any_spec = pl.BlockSpec(memory_space=pl.ANY)
    cparams = pltpu.CompilerParams(dimension_semantics=("parallel",))

    if rel_vmem:
        kernel = functools.partial(_transh_kernel_relvmem,
                                   tb=tb, d=D, r_pad=R_pad, l1_flag=l1_flag)
        grid_spec = pltpu.PrefetchScalarGridSpec(
            num_scalar_prefetch=4,
            grid=(num_tiles,),
            in_specs=[any_spec,
                      pl.BlockSpec((R_pad, two_d), lambda i, *_: (0, 0)),
                      pl.BlockSpec((tb, 1), lambda i, *_: (i, 0)),
                      pl.BlockSpec((tb, 1), lambda i, *_: (i, 0))],
            out_specs=[out_spec, out_spec],
            scratch_shapes=[pltpu.VMEM((tb, D), jnp.float32)] * 4
                           + [pltpu.SemaphoreType.DMA((4,))],
        )
        args = (ph, pt, nh, nt, ent_emb, relnorm_emb,
                pr.reshape(B_pad, 1), nr.reshape(B_pad, 1))
    else:
        kernel = functools.partial(_transh_kernel_reldma,
                                   tb=tb, d=D, l1_flag=l1_flag)
        grid_spec = pltpu.PrefetchScalarGridSpec(
            num_scalar_prefetch=6,
            grid=(num_tiles,),
            in_specs=[any_spec, any_spec],
            out_specs=[out_spec, out_spec],
            scratch_shapes=[pltpu.VMEM((tb, D), jnp.float32)] * 4
                           + [pltpu.VMEM((tb, two_d), jnp.float32)] * 2
                           + [pltpu.SemaphoreType.DMA((6,))],
        )
        args = (ph, pt, nh, nt, pr, nr, ent_emb, relnorm_emb)

    pos, neg = pl.pallas_call(kernel, out_shape=out_shapes,
                              grid_spec=grid_spec,
                              compiler_params=cparams)(*args)
    return pos.reshape(-1)[:B], neg.reshape(-1)[:B]


# ----------------------------------------------------------------------------
# Model wrapper mirroring the PyTorch TransHModel init + forward.
# ----------------------------------------------------------------------------
def _xavier_uniform(key, shape, dtype=jnp.float32):
    fan_in, fan_out = shape[1], shape[0]
    bound = jnp.sqrt(6.0 / (fan_in + fan_out))
    return jax.random.uniform(key, shape, dtype, minval=-bound, maxval=bound)


def _l2_normalize_rows(x, eps=1e-12):
    norm = jnp.sqrt(jnp.sum(x * x, axis=1, keepdims=True))
    return x / jnp.maximum(norm, eps)


class TransHModelPallas:
    def __init__(self, entity_total, relation_total, embedding_size,
                 l1_flag=True, key=None):
        if key is None:
            key = jax.random.PRNGKey(0)
        k_ent, k_rel, k_norm = jax.random.split(key, 3)
        self.l1_flag = l1_flag
        self.embedding_size = embedding_size
        d_pad = _round_up(embedding_size, 128)

        def init_table(k, n):
            w = _l2_normalize_rows(_xavier_uniform(k, (n, embedding_size)))
            # zero-pad embedding dim to a lane-aligned width; padding columns
            # contribute nothing to projections or score sums.
            return jnp.pad(w, ((0, 0), (0, d_pad - embedding_size)))

        self.ent_embeddings = init_table(k_ent, entity_total)
        self.rel_embeddings = init_table(k_rel, relation_total)
        self.norm_embeddings = init_table(k_norm, relation_total)
        # Precomputed rel||norm table so one gather fetches both rows.
        self.relnorm_embeddings = build_relnorm(self.rel_embeddings,
                                                self.norm_embeddings)

    def __call__(self, pos_h, pos_t, pos_r, neg_h, neg_t, neg_r):
        return transh_scores(
            self.ent_embeddings, self.relnorm_embeddings,
            pos_h, pos_t, pos_r, neg_h, neg_t, neg_r,
            l1_flag=self.l1_flag)


def _reference(ent, rel, norm, pos_h, pos_t, pos_r, neg_h, neg_t, neg_r, l1_flag):
    def project(e, w):
        return e - jnp.sum(e * w, axis=1, keepdims=True) * w

    ph = jnp.take(ent, pos_h, axis=0); pt = jnp.take(ent, pos_t, axis=0)
    pr = jnp.take(rel, pos_r, axis=0); pn = jnp.take(norm, pos_r, axis=0)
    nh = jnp.take(ent, neg_h, axis=0); nt = jnp.take(ent, neg_t, axis=0)
    nr = jnp.take(rel, neg_r, axis=0); nn_ = jnp.take(norm, neg_r, axis=0)

    ph, pt = project(ph, pn), project(pt, pn)
    nh, nt = project(nh, nn_), project(nt, nn_)
    if l1_flag:
        return (jnp.sum(jnp.abs(ph + pr - pt), axis=1),
                jnp.sum(jnp.abs(nh + nr - nt), axis=1))
    return (jnp.sum((ph + pr - pt) ** 2, axis=1),
            jnp.sum((nh + nr - nt) ** 2, axis=1))


if __name__ == "__main__":
    key = jax.random.PRNGKey(0)

    entity_total = 64
    relation_total = 16
    embedding_size = 32
    batch = 8

    model = TransHModelPallas(entity_total, relation_total, embedding_size,
                              l1_flag=True, key=key)

    k1, k2, k3, k4, k5, k6 = jax.random.split(jax.random.PRNGKey(0), 6)
    pos_h = jax.random.randint(k1, (batch,), 0, entity_total, dtype=jnp.int32)
    pos_t = jax.random.randint(k2, (batch,), 0, entity_total, dtype=jnp.int32)
    pos_r = jax.random.randint(k3, (batch,), 0, relation_total, dtype=jnp.int32)
    neg_h = jax.random.randint(k4, (batch,), 0, entity_total, dtype=jnp.int32)
    neg_t = jax.random.randint(k5, (batch,), 0, entity_total, dtype=jnp.int32)
    neg_r = jax.random.randint(k6, (batch,), 0, relation_total, dtype=jnp.int32)

    idx_args = (pos_h, pos_t, pos_r, neg_h, neg_t, neg_r)
    tables = (model.ent_embeddings, model.rel_embeddings, model.norm_embeddings)

    # Path A: relation rows gathered via one-hot MXU matmul (default for
    # FB15K-237-sized relation tables), L1 scoring.
    pos, neg = model(*idx_args)
    jax.block_until_ready((pos, neg))
    ref_pos, ref_neg = _reference(*tables, *idx_args, l1_flag=True)
    assert pos.shape == (batch,) and neg.shape == (batch,)
    assert jnp.allclose(pos, ref_pos, atol=1e-4, rtol=1e-5)
    assert jnp.allclose(neg, ref_neg, atol=1e-4, rtol=1e-5)

    # Path A, squared-L2 scoring branch (L1_flag=False).
    pos2, neg2 = transh_scores(model.ent_embeddings, model.relnorm_embeddings,
                               *idx_args, l1_flag=False)
    jax.block_until_ready((pos2, neg2))
    ref_pos2, ref_neg2 = _reference(*tables, *idx_args, l1_flag=False)
    assert jnp.allclose(pos2, ref_pos2, atol=1e-4, rtol=1e-5)
    assert jnp.allclose(neg2, ref_neg2, atol=1e-4, rtol=1e-5)

    # Path B: force the row-DMA fallback for relation rows (used when the
    # relation table is too large for VMEM).
    pos3, neg3 = transh_scores(model.ent_embeddings, model.relnorm_embeddings,
                               *idx_args, l1_flag=True,
                               rel_table_vmem_max_bytes=0)
    jax.block_until_ready((pos3, neg3))
    assert jnp.allclose(pos3, ref_pos, atol=1e-4, rtol=1e-5)
    assert jnp.allclose(neg3, ref_neg, atol=1e-4, rtol=1e-5)

    print("KERNEL_OK")
</pallas_src>

<mosaic_0001>
module attributes {stable_mosaic.version = 11 : i64} {
  func.func @_transh_kernel_relvmem(%arg0: i32, %arg1: memref<128xi32, #tpu.memory_space<smem>>, %arg2: memref<128xi32, #tpu.memory_space<smem>>, %arg3: memref<128xi32, #tpu.memory_space<smem>>, %arg4: memref<128xi32, #tpu.memory_space<smem>>, %arg5: memref<64x128xf32, #tpu.memory_space<any>>, %arg6: memref<128x256xf32, #tpu.memory_space<vmem>>, %arg7: memref<128x1xi32, #tpu.memory_space<vmem>>, %arg8: memref<128x1xi32, #tpu.memory_space<vmem>>, %arg9: memref<1x128xf32, #tpu.memory_space<vmem>>, %arg10: memref<1x128xf32, #tpu.memory_space<vmem>>, %arg11: memref<128x128xf32, #tpu.memory_space<vmem>>, %arg12: memref<128x128xf32, #tpu.memory_space<vmem>>, %arg13: memref<128x128xf32, #tpu.memory_space<vmem>>, %arg14: memref<128x128xf32, #tpu.memory_space<vmem>>, %arg15: memref<4x!tpu.dma_semaphore, #tpu.memory_space<semaphore_mem>>) attributes {dimension_semantics = [#tpu.dimension_semantics<parallel>], iteration_bounds = array<i64: 1>, scalar_prefetch = 4 : i64, scratch_operands = 5 : i64, tpu.core_type = #tpu.core_type<tc>, window_params = [{}, {pipeline_mode = #tpu.pipeline_mode<synchronous>, transform_indices = @transform_1, window_bounds = array<i64: 128, 256>}, {transform_indices = @transform_2, window_bounds = array<i64: 128, 1>}, {transform_indices = @transform_3, window_bounds = array<i64: 128, 1>}, {transform_indices = @transform_4, window_bounds = array<i64: 1, 128>}, {transform_indices = @transform_5, window_bounds = array<i64: 1, 128>}]} {
    %c128_i32 = arith.constant 128 : i32
    %0 = arith.muli %arg0, %c128_i32 : i32
    %c0_i32 = arith.constant 0 : i32
    %c128_i32_0 = arith.constant 128 : i32
    %1 = arith.addi %c0_i32, %c128_i32_0 : i32
    %c1_i32 = arith.constant 1 : i32
    scf.for %arg16 = %c0_i32 to %1 step %c1_i32  : i32 {
      %c1_i32_26 = arith.constant 1 : i32
      %56 = arith.muli %arg16, %c1_i32_26 : i32
      %c0_i32_27 = arith.constant 0 : i32
      %57 = arith.addi %c0_i32_27, %56 : i32
      %58 = arith.addi %0, %57 : i32
      %59 = arith.index_cast %58 : i32 to index
      %60 = memref.load %arg1[%59] : memref<128xi32, #tpu.memory_space<smem>>
      %c0_i32_28 = arith.constant 0 : i32
      %c0_i32_29 = arith.constant 0 : i32
      %61 = tpu.memref_slice %arg5[%60, %c0_i32_29] : memref<64x128xf32, #tpu.memory_space<any>> -> memref<1x128xf32, #tpu.memory_space<any>>
      %c0_i32_30 = arith.constant 0 : i32
      %62 = tpu.memref_slice %arg11[%57, %c0_i32_30] : memref<128x128xf32, #tpu.memory_space<vmem>> -> memref<1x128xf32, #tpu.memory_space<vmem>>
      %63 = tpu.memref_slice %arg15[%c0_i32_28] : memref<4x!tpu.dma_semaphore, #tpu.memory_space<semaphore_mem>> -> memref<1x!tpu.dma_semaphore, #tpu.memory_space<semaphore_mem>>
      %64 = tpu.memref_squeeze %63 : memref<1x!tpu.dma_semaphore, #tpu.memory_space<semaphore_mem>> -> memref<!tpu.dma_semaphore, #tpu.memory_space<semaphore_mem>>
      tpu.enqueue_dma source(%61 : memref<1x128xf32, #tpu.memory_space<any>>) target(%62 : memref<1x128xf32, #tpu.memory_space<vmem>>) target_semaphore(%64 : memref<!tpu.dma_semaphore, #tpu.memory_space<semaphore_mem>>)
      %65 = arith.addi %0, %57 : i32
      %66 = arith.index_cast %65 : i32 to index
      %67 = memref.load %arg2[%66] : memref<128xi32, #tpu.memory_space<smem>>
      %c1_i32_31 = arith.constant 1 : i32
      %c0_i32_32 = arith.constant 0 : i32
      %68 = tpu.memref_slice %arg5[%67, %c0_i32_32] : memref<64x128xf32, #tpu.memory_space<any>> -> memref<1x128xf32, #tpu.memory_space<any>>
      %c0_i32_33 = arith.constant 0 : i32
      %69 = tpu.memref_slice %arg12[%57, %c0_i32_33] : memref<128x128xf32, #tpu.memory_space<vmem>> -> memref<1x128xf32, #tpu.memory_space<vmem>>
      %70 = tpu.memref_slice %arg15[%c1_i32_31] : memref<4x!tpu.dma_semaphore, #tpu.memory_space<semaphore_mem>> -> memref<1x!tpu.dma_semaphore, #tpu.memory_space<semaphore_mem>>
      %71 = tpu.memref_squeeze %70 : memref<1x!tpu.dma_semaphore, #tpu.memory_space<semaphore_mem>> -> memref<!tpu.dma_semaphore, #tpu.memory_space<semaphore_mem>>
      tpu.enqueue_dma source(%68 : memref<1x128xf32, #tpu.memory_space<any>>) target(%69 : memref<1x128xf32, #tpu.memory_space<vmem>>) target_semaphore(%71 : memref<!tpu.dma_semaphore, #tpu.memory_space<semaphore_mem>>)
      %72 = arith.addi %0, %57 : i32
      %73 = arith.index_cast %72 : i32 to index
      %74 = memref.load %arg3[%73] : memref<128xi32, #tpu.memory_space<smem>>
      %c2_i32_34 = arith.constant 2 : i32
      %c0_i32_35 = arith.constant 0 : i32
      %75 = tpu.memref_slice %arg5[%74, %c0_i32_35] : memref<64x128xf32, #tpu.memory_space<any>> -> memref<1x128xf32, #tpu.memory_space<any>>
      %c0_i32_36 = arith.constant 0 : i32
      %76 = tpu.memref_slice %arg13[%57, %c0_i32_36] : memref<128x128xf32, #tpu.memory_space<vmem>> -> memref<1x128xf32, #tpu.memory_space<vmem>>
      %77 = tpu.memref_slice %arg15[%c2_i32_34] : memref<4x!tpu.dma_semaphore, #tpu.memory_space<semaphore_mem>> -> memref<1x!tpu.dma_semaphore, #tpu.memory_space<semaphore_mem>>
      %78 = tpu.memref_squeeze %77 : memref<1x!tpu.dma_semaphore, #tpu.memory_space<semaphore_mem>> -> memref<!tpu.dma_semaphore, #tpu.memory_space<semaphore_mem>>
      tpu.enqueue_dma source(%75 : memref<1x128xf32, #tpu.memory_space<any>>) target(%76 : memref<1x128xf32, #tpu.memory_space<vmem>>) target_semaphore(%78 : memref<!tpu.dma_semaphore, #tpu.memory_space<semaphore_mem>>)
      %79 = arith.addi %0, %57 : i32
      %80 = arith.index_cast %79 : i32 to index
      %81 = memref.load %arg4[%80] : memref<128xi32, #tpu.memory_space<smem>>
      %c3_i32_37 = arith.constant 3 : i32
      %c0_i32_38 = arith.constant 0 : i32
      %82 = tpu.memref_slice %arg5[%81, %c0_i32_38] : memref<64x128xf32, #tpu.memory_space<any>> -> memref<1x128xf32, #tpu.memory_space<any>>
      %c0_i32_39 = arith.constant 0 : i32
      %83 = tpu.memref_slice %arg14[%57, %c0_i32_39] : memref<128x128xf32, #tpu.memory_space<vmem>> -> memref<1x128xf32, #tpu.memory_space<vmem>>
      %84 = tpu.memref_slice %arg15[%c3_i32_37] : memref<4x!tpu.dma_semaphore, #tpu.memory_space<semaphore_mem>> -> memref<1x!tpu.dma_semaphore, #tpu.memory_space<semaphore_mem>>
      %85 = tpu.memref_squeeze %84 : memref<1x!tpu.dma_semaphore, #tpu.memory_space<semaphore_mem>> -> memref<!tpu.dma_semaphore, #tpu.memory_space<semaphore_mem>>
      tpu.enqueue_dma source(%82 : memref<1x128xf32, #tpu.memory_space<any>>) target(%83 : memref<1x128xf32, #tpu.memory_space<vmem>>) target_semaphore(%85 : memref<!tpu.dma_semaphore, #tpu.memory_space<semaphore_mem>>)
    }
    %c128_i32_1 = arith.constant 128 : i32
    %c0 = arith.constant 0 : index
    %c0_2 = arith.constant 0 : index
    %2 = vector.load %arg6[%c0, %c0_2] : memref<128x256xf32, #tpu.memory_space<vmem>>, vector<128x256xf32>
    %3 = tpu.iota {dimensions = array<i32: 1>} : vector<128x128xi32>
    %c0_3 = arith.constant 0 : index
    %c0_4 = arith.constant 0 : index
    %4 = vector.load %arg7[%c0_3, %c0_4] : memref<128x1xi32, #tpu.memory_space<vmem>>, vector<128x1xi32>
    %5 = vector.broadcast %4 : vector<128x1xi32> to vector<128x128xi32>
    %6 = arith.cmpi eq, %5, %3 : vector<128x128xi32>
    %7 = arith.extui %6 : vector<128x128xi1> to vector<128x128xi32>
    %8 = arith.sitofp %7 : vector<128x128xi32> to vector<128x128xf32>
    %c0_5 = arith.constant 0 : index
    %c0_6 = arith.constant 0 : index
    %9 = vector.load %arg8[%c0_5, %c0_6] : memref<128x1xi32, #tpu.memory_space<vmem>>, vector<128x1xi32>
    %10 = vector.broadcast %9 : vector<128x1xi32> to vector<128x128xi32>
    %11 = arith.cmpi eq, %10, %3 : vector<128x128xi32>
    %12 = arith.extui %11 : vector<128x128xi1> to vector<128x128xi32>
    %13 = arith.sitofp %12 : vector<128x128xi32> to vector<128x128xf32>
    %cst = arith.constant dense<0.000000e+00> : vector<128x256xf32>
    %14 = tpu.matmul %8, %2, %cst {dimension_numbers = #tpu.dot_dimension_numbers<[1], [0], [0], [1], [0, 0, 1, 1], [], []>} : vector<128x128xf32>, vector<128x256xf32>, vector<128x256xf32> -> vector<128x256xf32>
    %cst_7 = arith.constant dense<0.000000e+00> : vector<128x256xf32>
    %15 = tpu.matmul %13, %2, %cst_7 {dimension_numbers = #tpu.dot_dimension_numbers<[1], [0], [0], [1], [0, 0, 1, 1], [], []>} : vector<128x128xf32>, vector<128x256xf32>, vector<128x256xf32> -> vector<128x256xf32>
    %c0_i32_8 = arith.constant 0 : i32
    %16 = tpu.memref_slice %arg15[%c0_i32_8] : memref<4x!tpu.dma_semaphore, #tpu.memory_space<semaphore_mem>> -> memref<1x!tpu.dma_semaphore, #tpu.memory_space<semaphore_mem>>
    %17 = tpu.memref_squeeze %16 : memref<1x!tpu.dma_semaphore, #tpu.memory_space<semaphore_mem>> -> memref<!tpu.dma_semaphore, #tpu.memory_space<semaphore_mem>>
    tpu.wait_dma2 semaphore(%17 : memref<!tpu.dma_semaphore, #tpu.memory_space<semaphore_mem>>) src(%arg11 : memref<128x128xf32, #tpu.memory_space<vmem>>) dst(%arg11 : memref<128x128xf32, #tpu.memory_space<vmem>>)
    %c1_i32_9 = arith.constant 1 : i32
    %18 = tpu.memref_slice %arg15[%c1_i32_9] : memref<4x!tpu.dma_semaphore, #tpu.memory_space<semaphore_mem>> -> memref<1x!tpu.dma_semaphore, #tpu.memory_space<semaphore_mem>>
    %19 = tpu.memref_squeeze %18 : memref<1x!tpu.dma_semaphore, #tpu.memory_space<semaphore_mem>> -> memref<!tpu.dma_semaphore, #tpu.memory_space<semaphore_mem>>
    tpu.wait_dma2 semaphore(%19 : memref<!tpu.dma_semaphore, #tpu.memory_space<semaphore_mem>>) src(%arg12 : memref<128x128xf32, #tpu.memory_space<vmem>>) dst(%arg12 : memref<128x128xf32, #tpu.memory_space<vmem>>)
    %c2_i32 = arith.constant 2 : i32
    %20 = tpu.memref_slice %arg15[%c2_i32] : memref<4x!tpu.dma_semaphore, #tpu.memory_space<semaphore_mem>> -> memref<1x!tpu.dma_semaphore, #tpu.memory_space<semaphore_mem>>
    %21 = tpu.memref_squeeze %20 : memref<1x!tpu.dma_semaphore, #tpu.memory_space<semaphore_mem>> -> memref<!tpu.dma_semaphore, #tpu.memory_space<semaphore_mem>>
    tpu.wait_dma2 semaphore(%21 : memref<!tpu.dma_semaphore, #tpu.memory_space<semaphore_mem>>) src(%arg13 : memref<128x128xf32, #tpu.memory_space<vmem>>) dst(%arg13 : memref<128x128xf32, #tpu.memory_space<vmem>>)
    %c3_i32 = arith.constant 3 : i32
    %22 = tpu.memref_slice %arg15[%c3_i32] : memref<4x!tpu.dma_semaphore, #tpu.memory_space<semaphore_mem>> -> memref<1x!tpu.dma_semaphore, #tpu.memory_space<semaphore_mem>>
    %23 = tpu.memref_squeeze %22 : memref<1x!tpu.dma_semaphore, #tpu.memory_space<semaphore_mem>> -> memref<!tpu.dma_semaphore, #tpu.memory_space<semaphore_mem>>
    tpu.wait_dma2 semaphore(%23 : memref<!tpu.dma_semaphore, #tpu.memory_space<semaphore_mem>>) src(%arg14 : memref<128x128xf32, #tpu.memory_space<vmem>>) dst(%arg14 : memref<128x128xf32, #tpu.memory_space<vmem>>)
    %c0_10 = arith.constant 0 : index
    %c0_11 = arith.constant 0 : index
    %24 = vector.load %arg11[%c0_10, %c0_11] : memref<128x128xf32, #tpu.memory_space<vmem>>, vector<128x128xf32>
    %c0_12 = arith.constant 0 : index
    %c0_13 = arith.constant 0 : index
    %25 = vector.load %arg12[%c0_12, %c0_13] : memref<128x128xf32, #tpu.memory_space<vmem>>, vector<128x128xf32>
    %26 = vector.extract_strided_slice %14 {offsets = [0, 0], sizes = [128, 128], strides = [1, 1]} : vector<128x256xf32> to vector<128x128xf32>
    %27 = vector.extract_strided_slice %14 {offsets = [0, 128], sizes = [128, 128], strides = [1, 1]} : vector<128x256xf32> to vector<128x128xf32>
    %28 = arith.subf %24, %25 : vector<128x128xf32>
    %29 = arith.addf %28, %26 : vector<128x128xf32>
    %30 = arith.mulf %28, %27 : vector<128x128xf32>
    %cst_14 = arith.constant dense<0.000000e+00> : vector<128xf32>
    %31 = vector.multi_reduction <add>, %30, %cst_14 [1] : vector<128x128xf32> to vector<128xf32>
    %32 = vector.shape_cast %31 : vector<128xf32> to vector<128x1xf32>
    %33 = vector.broadcast %32 : vector<128x1xf32> to vector<128x128xf32>
    %34 = arith.mulf %33, %27 : vector<128x128xf32>
    %35 = arith.subf %29, %34 : vector<128x128xf32>
    %36 = math.absf %35 : vector<128x128xf32>
    %cst_15 = arith.constant dense<0.000000e+00> : vector<128xf32>
    %37 = vector.multi_reduction <add>, %36, %cst_15 [1] : vector<128x128xf32> to vector<128xf32>
    %c0_16 = arith.constant 0 : index
    %c0_17 = arith.constant 0 : index
    %38 = vector.load %arg13[%c0_16, %c0_17] : memref<128x128xf32, #tpu.memory_space<vmem>>, vector<128x128xf32>
    %c0_18 = arith.constant 0 : index
    %c0_19 = arith.constant 0 : index
    %39 = vector.load %arg14[%c0_18, %c0_19] : memref<128x128xf32, #tpu.memory_space<vmem>>, vector<128x128xf32>
    %40 = vector.extract_strided_slice %15 {offsets = [0, 0], sizes = [128, 128], strides = [1, 1]} : vector<128x256xf32> to vector<128x128xf32>
    %41 = vector.extract_strided_slice %15 {offsets = [0, 128], sizes = [128, 128], strides = [1, 1]} : vector<128x256xf32> to vector<128x128xf32>
    %42 = arith.subf %38, %39 : vector<128x128xf32>
    %43 = arith.addf %42, %40 : vector<128x128xf32>
    %44 = arith.mulf %42, %41 : vector<128x128xf32>
    %cst_20 = arith.constant dense<0.000000e+00> : vector<128xf32>
    %45 = vector.multi_reduction <add>, %44, %cst_20 [1] : vector<128x128xf32> to vector<128xf32>
    %46 = vector.shape_cast %45 : vector<128xf32> to vector<128x1xf32>
    %47 = vector.broadcast %46 : vector<128x1xf32> to vector<128x128xf32>
    %48 = arith.mulf %47, %41 : vector<128x128xf32>
    %49 = arith.subf %43, %48 : vector<128x128xf32>
    %50 = math.absf %49 : vector<128x128xf32>
    %cst_21 = arith.constant dense<0.000000e+00> : vector<128xf32>
    %51 = vector.multi_reduction <add>, %50, %cst_21 [1] : vector<128x128xf32> to vector<128xf32>
    %52 = vector.shape_cast %37 : vector<128xf32> to vector<1x128xf32>
    %c0_22 = arith.constant 0 : index
    %c0_23 = arith.constant 0 : index
    %53 = vector.load %arg9[%c0_22, %c0_23] : memref<1x128xf32, #tpu.memory_space<vmem>>, vector<1x128xf32>
    tpu.vector_store %arg9[%c0_22, %c0_23], %52 {strides = array<i32>} : memref<1x128xf32, #tpu.memory_space<vmem>>, vector<1x128xf32>,
    %54 = vector.shape_cast %51 : vector<128xf32> to vector<1x128xf32>
    %c0_24 = arith.constant 0 : index
    %c0_25 = arith.constant 0 : index
    %55 = vector.load %arg10[%c0_24, %c0_25] : memref<1x128xf32, #tpu.memory_space<vmem>>, vector<1x128xf32>
    tpu.vector_store %arg10[%c0_24, %c0_25], %54 {strides = array<i32>} : memref<1x128xf32, #tpu.memory_space<vmem>>, vector<1x128xf32>,
    return
  }
  func.func @transform_1(%arg0: i32, %arg1: memref<128xi32, #tpu.memory_space<smem>>, %arg2: memref<128xi32, #tpu.memory_space<smem>>, %arg3: memref<128xi32, #tpu.memory_space<smem>>, %arg4: memref<128xi32, #tpu.memory_space<smem>>) -> (i32, i32) {
    %c0_i32 = arith.constant 0 : i32
    %c0_i32_0 = arith.constant 0 : i32
    %c0_i32_1 = arith.constant 0 : i32
    return %c0_i32, %c0_i32_0 : i32, i32
  }
  func.func @transform_2(%arg0: i32, %arg1: memref<128xi32, #tpu.memory_space<smem>>, %arg2: memref<128xi32, #tpu.memory_space<smem>>, %arg3: memref<128xi32, #tpu.memory_space<smem>>, %arg4: memref<128xi32, #tpu.memory_space<smem>>) -> (i32, i32) {
    %c0_i32 = arith.constant 0 : i32
    %c0_i32_0 = arith.constant 0 : i32
    return %arg0, %c0_i32 : i32, i32
  }
  func.func @transform_3(%arg0: i32, %arg1: memref<128xi32, #tpu.memory_space<smem>>, %arg2: memref<128xi32, #tpu.memory_space<smem>>, %arg3: memref<128xi32, #tpu.memory_space<smem>>, %arg4: memref<128xi32, #tpu.memory_space<smem>>) -> (i32, i32) {
    %c0_i32 = arith.constant 0 : i32
    %c0_i32_0 = arith.constant 0 : i32
    return %arg0, %c0_i32 : i32, i32
  }
  func.func @transform_4(%arg0: i32, %arg1: memref<128xi32, #tpu.memory_space<smem>>, %arg2: memref<128xi32, #tpu.memory_space<smem>>, %arg3: memref<128xi32, #tpu.memory_space<smem>>, %arg4: memref<128xi32, #tpu.memory_space<smem>>) -> (i32, i32) {
    %c0_i32 = arith.constant 0 : i32
    %c0_i32_0 = arith.constant 0 : i32
    return %arg0, %c0_i32 : i32, i32
  }
  func.func @transform_5(%arg0: i32, %arg1: memref<128xi32, #tpu.memory_space<smem>>, %arg2: memref<128xi32, #tpu.memory_space<smem>>, %arg3: memref<128xi32, #tpu.memory_space<smem>>, %arg4: memref<128xi32, #tpu.memory_space<smem>>) -> (i32, i32) {
    %c0_i32 = arith.constant 0 : i32
    %c0_i32_0 = arith.constant 0 : i32
    return %arg0, %c0_i32 : i32, i32
  }
}

</mosaic_0001>

<bundles_post_ra>
// kernel: tpu_custom_call.1
= control target key start
LH: loop header
LB: loop body
LE: loop exit
PB: predicated region body
PF: predicated region fallthrough
CT: control target
= control target key end

     0   :  { %s2768_s0 = inlined_call_operand.vmem [shape: s32[128], index: 0, kind: input, shape index: {}]   ;;  %s2769_s4 = inlined_call_operand.hbm [shape: f32[64,128], index: 4, kind: input, shape index: {}]   ;;  %s2770_s5 = inlined_call_operand.vmem [shape: f32[128,256], index: 5, kind: input, shape index: {}]   ;;  %s2771_s6 = inlined_call_operand.vmem [shape: s32[128,1], index: 6, kind: input, shape index: {}]   ;;  %s2772_s7 = inlined_call_operand.vmem [shape: s32[128,1], index: 7, kind: input, shape index: {}]   ;;  %s2773_s8 = inlined_call_operand.hbm [shape: f32[1,128], index: 8, kind: output, shape index: {0}]   ;;  %s2774_s9 = inlined_call_operand.hbm [shape: f32[1,128], index: 9, kind: output, shape index: {1}]   ;;  %s2775_s1 = inlined_call_operand.vmem [shape: s32[128], index: 1, kind: input, shape index: {}]   ;;  %s2776_s2 = inlined_call_operand.vmem [shape: s32[128], index: 2, kind: input, shape index: {}]   ;;  %s2777_s3 = inlined_call_operand.vmem [shape: s32[128], index: 3, kind: input, shape index: {}]  }
   0x1   :  { %s15_s11 = sshll.u32 %s2768_s0, 4  ;;  %s19_s14 = sshll.u32 %s2775_s1, 4  ;;  %s16_s11 = int_to_ptr.vmem [resolvable:$true] %s15_s11  ;;  %s20_s14 = int_to_ptr.vmem [resolvable:$true] %s19_s14 }
   0x2   :  { %s1539_s15 = scalar_lea.vmem %s16_s11, 16  ;;  %p1544_p1 = scmp.lt.s32.totalorder %s16_s11, %s16_s11 }
   0x3   :  { %p1540_p0 = scmp.ne.s32.totalorder %s16_s11, %s1539_s15  ;;  %p1545_p2 = scmp.lt.s32.totalorder %s1539_s15, %s1539_s15 }
   0x5   :  { %p1546_p3 = por %p1545_p2, %p1544_p1 }
   0x7   :  { %p1547_p4 = pnand %p1546_p3, %p1540_p0 }
   0x9   :  { %1550 = shalt.err (!%p1547_p4)  }
   0xa   :  { %s1749_s16 = smov [#allocation8]   ;;  %s1551_s17 = scalar_lea.vmem %s20_s14, 16 }
   0xb   :  { %18 = dma.vmem_to_smem %s16_s11, 16, %s1749_s16, [#allocation7] }
   0xc   :  { %p1552_p5 = scmp.ne.s32.totalorder %s20_s14, %s1551_s17  ;;  %p1556_p6 = scmp.lt.s32.totalorder %s20_s14, %s20_s14 }
   0xd   :  { %p1557_p7 = scmp.lt.s32.totalorder %s1551_s17, %s1551_s17 }
   0xf   :  { %p1558_p8 = por %p1557_p7, %p1556_p6 }
  0x11   :  { %p1559_p9 = pnand %p1558_p8, %p1552_p5 }
  0x13   :  { %1562 = shalt.err (!%p1559_p9)  }
  0x14   :  { %s1750_s0 = smov [#allocation9]   ;;  %s23_s19 = sshll.u32 %s2776_s2, 4  ;;  %s24_s19 = int_to_ptr.vmem [resolvable:$true] %s23_s19 }
  0x15   :  { %22 = dma.vmem_to_smem %s20_s14, 16, %s1750_s0, [#allocation7] }
  0x16   :  { %s27_s22 = sshll.u32 %s2777_s3, 4  ;;  %s1563_s23 = scalar_lea.vmem %s24_s19, 16  ;;  %s28_s22 = int_to_ptr.vmem [resolvable:$true] %s27_s22 }
  0x17   :  { %p1564_p10 = scmp.ne.s32.totalorder %s24_s19, %s1563_s23  ;;  %p1568_p11 = scmp.lt.s32.totalorder %s24_s19, %s24_s19 }
  0x18   :  { %p1569_p12 = scmp.lt.s32.totalorder %s1563_s23, %s1563_s23 }
  0x1a   :  { %p1570_p13 = por %p1569_p12, %p1568_p11 }
  0x1c   :  { %p1571_p0 = pnand %p1570_p13, %p1564_p10 }
  0x1e   :  { %1574 = shalt.err (!%p1571_p0)  }
  0x1f   :  { %s1751_s24 = smov [#allocation10]   ;;  %s1575_s25 = scalar_lea.vmem %s28_s22, 16 }
  0x20   :  { %26 = dma.vmem_to_smem %s24_s19, 16, %s1751_s24, [#allocation7] }
  0x21   :  { %p1576_p1 = scmp.ne.s32.totalorder %s28_s22, %s1575_s25  ;;  %p1580_p2 = scmp.lt.s32.totalorder %s28_s22, %s28_s22 }
  0x22   :  { %p1581_p3 = scmp.lt.s32.totalorder %s1575_s25, %s1575_s25 }
  0x24   :  { %p1582_p4 = por %p1581_p3, %p1580_p2 }
  0x26   :  { %p1583_p5 = pnand %p1582_p4, %p1576_p1 }
  0x28   :  { %1586 = shalt.err (!%p1583_p5)  }
  0x29   :  { %s1752_s2 = smov [#allocation11]  }
  0x2a   :  { %30 = dma.vmem_to_smem %s28_s22, 16, %s1752_s2, [#allocation7] }
  0x2b   :  { %1731 = dma.done.wait [#allocation7], 64 }
  0x2c   :  { %1732 = vsyncadd [#allocation7], 4294967232 }
  0x2d   :  { %32 = sfence }
  0x2e   :  { %33 = vsyncpa [#allocation13], 0 }
  0x2f   :  { %34 = vsyncpa [#allocation15], 0  ;;  %s1824_s3 = smov 0  }
  0x30 LB: > { %s49_s26 = sld [smem:[#allocation8 + %s1747_s3]]  ;;  %s52_s27 = scalar_lea.vmem [#allocation2], %s1747_s3  ;;  %s1747_s3 = sphi %s1824_s3, %s47_s3  }
  0x31   : > { %s60_s28 = sshll.u32 %s52_s27, 4  ;;  %s1832_s29 = sld [smem:[#allocation9 + %s1747_s3]]  ;;  %s1834_s28 = int_to_ptr.vmem [resolvable:$true] %s60_s28 }
  0x32   : > { %s67_s30 = scalar_lea.vmem [#allocation3], %s1747_s3  ;;  %s1838_s11 = sld [smem:[#allocation10 + %s1747_s3]] }
  0x33   : > { %s76_s10 = sshll.u32 %s67_s30, 4  ;;  %s83_s12 = scalar_lea.vmem [#allocation4], %s1747_s3  ;;  %s1840_s10 = int_to_ptr.vmem [resolvable:$true] %s76_s10 }
  0x34   : > { %s92_s13 = sshll.u32 %s83_s12, 4  ;;  %s1844_s14 = sld [smem:[#allocation11 + %s1747_s3]]  ;;  %s1846_s13 = int_to_ptr.vmem [resolvable:$true] %s92_s13 }
  0x35   : > { %s1855_s21 = scalar_lea.hbm %s2769_s4, 1024 }
  0x36   : > { %s1384_s15 = sshll.u32 %s49_s26, 4 }
  0x37   : > { %s51_s0 = scalar_lea.hbm %s2769_s4, %s1384_s15  ;;  %s1385_s1 = sshll.u32 %s1832_s29, 4 }
  0x38   : > { %s1587_s18 = scalar_lea.hbm %s51_s0, 16  ;;  %p1590_p7 = scmp.lt.u32.totalorder %s51_s0, %s2769_s4 }
  0x39   : > { %p1588_p6 = scmp.ne.s32.totalorder %s51_s0, %s1587_s18  ;;  %p1591_p8 = scmp.lt.u32.totalorder %s1855_s21, %s1587_s18 }
  0x3a   : > { %p1593_p10 = scmp.lt.u32.totalorder %s1587_s18, %s51_s0 }
  0x3b   : > { %p1592_p9 = por %p1591_p8, %p1590_p7 }
  0x3d   : > { %p1594_p11 = por %p1593_p10, %p1592_p9 }
  0x3f   : > { %p1595_p12 = pnand %p1594_p11, %p1588_p6 }
  0x41   : > { %1598 = shalt.err (!%p1595_p12)  }
  0x42   : > { %s1599_s24 = scalar_lea.vmem %s1834_s28, 16  ;;  %s1753_s25 = smov [#allocation2]  }
  0x43   : > { %p1600_p13 = scmp.ne.s32.totalorder %s1834_s28, %s1599_s24  ;;  %s1601_s2 = sshll.u32 %s1753_s25, 4  ;;  %s1602_s2 = int_to_ptr.vmem [resolvable:$false] %s1601_s2 }
  0x44   : > { %s1603_s26 = scalar_lea.vmem %s1602_s2, 2048  ;;  %p1604_p0 = scmp.lt.s32.totalorder %s1834_s28, %s1602_s2 }
  0x45   : > { %p1605_p1 = scmp.lt.s32.totalorder %s1603_s26, %s1599_s24 }
  0x47   : > { %p1606_p2 = por %p1605_p1, %p1604_p0 }
  0x49   : > { %p1607_p3 = pnand %p1606_p2, %p1600_p13 }
  0x4b   : > { %1610 = shalt.err (!%p1607_p3)  }
  0x4c   : > { %63 = dma.hbm_to_vmem [thread:$0]  %s51_s0, 16, %s1834_s28, [#allocation6] }
  0x4d   : > { %s66_s30 = scalar_lea.hbm %s2769_s4, %s1385_s1  ;;  %s1386_s12 = sshll.u32 %s1838_s11, 4 }
  0x4e   : > { %s1611_s15 = scalar_lea.hbm %s66_s30, 16  ;;  %p1614_p5 = scmp.lt.u32.totalorder %s66_s30, %s2769_s4 }
  0x4f   : > { %p1612_p4 = scmp.ne.s32.totalorder %s66_s30, %s1611_s15  ;;  %p1615_p6 = scmp.lt.u32.totalorder %s1855_s21, %s1611_s15 }
  0x50   : > { %p1617_p8 = scmp.lt.u32.totalorder %s1611_s15, %s66_s30 }
  0x51   : > { %p1616_p7 = por %p1615_p6, %p1614_p5 }
  0x53   : > { %p1618_p9 = por %p1617_p8, %p1616_p7 }
  0x55   : > { %p1619_p10 = pnand %p1618_p9, %p1612_p4 }
  0x57   : > { %1622 = shalt.err (!%p1619_p10)  }
  0x58   : > { %s1623_s28 = scalar_lea.vmem %s1840_s10, 16  ;;  %s1754_s0 = smov [#allocation3]  }
  0x59   : > { %p1624_p11 = scmp.ne.s32.totalorder %s1840_s10, %s1623_s28  ;;  %s1625_s1 = sshll.u32 %s1754_s0, 4  ;;  %s1626_s1 = int_to_ptr.vmem [resolvable:$false] %s1625_s1 }
  0x5a   : > { %s1627_s11 = scalar_lea.vmem %s1626_s1, 2048  ;;  %p1628_p12 = scmp.lt.s32.totalorder %s1840_s10, %s1626_s1 }
  0x5b   : > { %p1629_p13 = scmp.lt.s32.totalorder %s1627_s11, %s1623_s28 }
  0x5d   : > { %p1630_p0 = por %p1629_p13, %p1628_p12 }
  0x5f   : > { %p1631_p1 = pnand %p1630_p0, %p1624_p11 }
  0x61   : > { %1634 = shalt.err (!%p1631_p1)  }
  0x62   : > { %79 = dma.hbm_to_vmem [thread:$0]  %s66_s30, 16, %s1840_s10, [#allocation6 + $0x1] }
  0x63   : > { %s82_s20 = scalar_lea.hbm %s2769_s4, %s1386_s12  ;;  %s1387_s22 = sshll.u32 %s1844_s14, 4 }
  0x64   : > { %s1635_s23 = scalar_lea.hbm %s82_s20, 16  ;;  %p1638_p3 = scmp.lt.u32.totalorder %s82_s20, %s2769_s4 }
  0x65   : > { %p1636_p2 = scmp.ne.s32.totalorder %s82_s20, %s1635_s23  ;;  %p1639_p4 = scmp.lt.u32.totalorder %s1855_s21, %s1635_s23 }
  0x66   : > { %p1641_p6 = scmp.lt.u32.totalorder %s1635_s23, %s82_s20 }
  0x67   : > { %p1640_p5 = por %p1639_p4, %p1638_p3 }
  0x69   : > { %p1642_p7 = por %p1641_p6, %p1640_p5 }
  0x6b   : > { %p1643_p8 = pnand %p1642_p7, %p1636_p2 }
  0x6d   : > { %1646 = shalt.err (!%p1643_p8)  }
  0x6e   : > { %s1647_s10 = scalar_lea.vmem %s1846_s13, 16  ;;  %s1755_s2 = smov [#allocation4]  }
  0x6f   : > { %p1648_p9 = scmp.ne.s32.totalorder %s1846_s13, %s1647_s10  ;;  %s1649_s26 = sshll.u32 %s1755_s2, 4  ;;  %s1650_s26 = int_to_ptr.vmem [resolvable:$false] %s1649_s26 }
  0x70   : > { %s1651_s14 = scalar_lea.vmem %s1650_s26, 2048  ;;  %p1652_p10 = scmp.lt.s32.totalorder %s1846_s13, %s1650_s26 }
  0x71   : > { %p1653_p11 = scmp.lt.s32.totalorder %s1651_s14, %s1647_s10 }
  0x73   : > { %p1654_p12 = por %p1653_p11, %p1652_p10 }
  0x75   : > { %p1655_p13 = pnand %p1654_p12, %p1648_p9 }
  0x77   : > { %1658 = shalt.err (!%p1655_p13)  }
  0x78   : > { %95 = dma.hbm_to_vmem [thread:$0]  %s82_s20, 16, %s1846_s13, [#allocation6 + $0x2] }
  0x79   : > { %s98_s30 = scalar_lea.hbm %s2769_s4, %s1387_s22  ;;  %s99_s12 = scalar_lea.vmem [#allocation5], %s1747_s3 }
  0x7a   : > { %s108_s15 = sshll.u32 %s99_s12, 4  ;;  %s1659_s16 = scalar_lea.hbm %s98_s30, 16  ;;  %s109_s15 = int_to_ptr.vmem [resolvable:$true] %s108_s15 }
  0x7b   : > { %p1660_p0 = scmp.ne.s32.totalorder %s98_s30, %s1659_s16  ;;  %p1662_p1 = scmp.lt.u32.totalorder %s98_s30, %s2769_s4 }
  0x7c   : > { %p1663_p2 = scmp.lt.u32.totalorder %s1855_s21, %s1659_s16  ;;  %p1665_p4 = scmp.lt.u32.totalorder %s1659_s16, %s98_s30 }
  0x7e   : > { %p1664_p3 = por %p1663_p2, %p1662_p1 }
  0x80   : > { %p1666_p5 = por %p1665_p4, %p1664_p3 }
  0x82   : > { %p1667_p6 = pnand %p1666_p5, %p1660_p0 }
  0x84   : > { %1670 = shalt.err (!%p1667_p6)  }
  0x85   : > { %s1671_s13 = scalar_lea.vmem %s109_s15, 16  ;;  %s1756_s0 = smov [#allocation5]  }
  0x86   : > { %p1672_p7 = scmp.ne.s32.totalorder %s109_s15, %s1671_s13  ;;  %s1673_s1 = sshll.u32 %s1756_s0, 4  ;;  %s1674_s1 = int_to_ptr.vmem [resolvable:$false] %s1673_s1 }
  0x87   : > { %s1675_s11 = scalar_lea.vmem %s1674_s1, 2048  ;;  %p1676_p8 = scmp.lt.s32.totalorder %s109_s15, %s1674_s1 }
  0x88   : > { %p1677_p9 = scmp.lt.s32.totalorder %s1675_s11, %s1671_s13 }
  0x8a   : > { %p1678_p10 = por %p1677_p9, %p1676_p8 }
  0x8c   : > { %p1679_p11 = pnand %p1678_p10, %p1672_p7 }
  0x8e   : > { %1682 = shalt.err (!%p1679_p11)  }
  0x8f   : > { %111 = dma.hbm_to_vmem [thread:$0]  %s98_s30, 16, %s109_s15, [#allocation6 + $0x3] }
  0x90   : > { %s47_s3 = sadd.s32 1, %s1747_s3  }
  0x91   : > { %p44_p12 = scmp.ge.s32.totalorder %s47_s3, 128  }
  0x92   :  { %v147_v0 = vld [vmem:[%s2771_s6 + $0x8] sm:$0xff] (%p44_p12)  ;;  %v146_v1 = vld [vmem:[%s2771_s6] sm:$0xff] (%p44_p12)  ;;  %v1757_v2 = vmov (%p44_p12), 0   ;;  %v1758_v5 = vmov (%p44_p12), 0.0   ;;  %v260_v6 = vld [vmem:[%s2772_s7 + $0x10] sm:$0xff] (%p44_p12) }
  0x93   :  { %46 = sbr.rel (!%p44_p12) target bundleno = 48 (0x30), region = 80  ;;  %1538 = vset.pattern.permute.xlu1 (%p44_p12), %v1757_v2  ;;  %1537 = vset.pattern.permute.xlu0 (%p44_p12), %v1757_v2  ;;  %v259_v3 = vld [vmem:[%s2772_s7 + $0x8] sm:$0xff] (%p44_p12)  ;;  %v258_v4 = vld [vmem:[%s2772_s7] sm:$0xff] (%p44_p12)  ;;  %v148_v7 = vld [vmem:[%s2771_s6 + $0x10] sm:$0xff] (%p44_p12) }
  0x94   :  { %166 = vperm.xlu1 (%p44_p12), %1538, %v147_v0   ;;  %163 = vperm.xlu0 (%p44_p12), %1537, %v146_v1   ;;  %v261_v8 = vld [vmem:[%s2772_s7 + $0x18] sm:$0xff] (%p44_p12)  ;;  %v113_v10 = vld [vmem:[%s2770_s5 + $0x8] sm:$0xff] (%p44_p12)  ;;  %v112_v12 = vld [vmem:[%s2770_s5] sm:$0xff] (%p44_p12) }
  0x95   :  { %434 = vmatprep.mubr.f32.mxu0 (%p44_p12), %v1758_v5  ;;  %595 = vmatprep.mubr.f32.mxu1 (%p44_p12), %v1758_v5  ;;  %v149_v9 = vld [vmem:[%s2771_s6 + $0x18] sm:$0xff] (%p44_p12)  ;;  %v114_v13 = vld [vmem:[%s2770_s5 + $0x10] sm:$0xff] (%p44_p12)  ;;  %v117_v16 = vld [vmem:[%s2770_s5 + $0x28] sm:$0xff] (%p44_p12) }
  0x96   :  { %v115_v11 = vld [vmem:[%s2770_s5 + $0x18] sm:$0xff] (%p44_p12)  ;;  %v1458_v15 = vpack.c.bf16 (%p44_p12), %v114_v13, %v112_v12  ;;  %v116_v19 = vld [vmem:[%s2770_s5 + $0x20] sm:$0xff] (%p44_p12)  ;;  %v118_v20 = vld [vmem:[%s2770_s5 + $0x30] sm:$0xff] (%p44_p12) }
  0x97   :  { %v1456_v14 = vpack.c.bf16 (%p44_p12), %v115_v11, %v113_v10  ;;  %v119_v17 = vld [vmem:[%s2770_s5 + $0x38] sm:$0xff] (%p44_p12)  ;;  %v121_v21 = vld [vmem:[%s2770_s5 + $0x48] sm:$0xff] (%p44_p12)  ;;  %v262_v23 = vld [vmem:[%s2772_s7 + $0x20] sm:$0xff] (%p44_p12)  ;;  %v1462_v25 = vpack.c.bf16 (%p44_p12), %v118_v20, %v116_v19  ;;  %v2778_v19 = vlaneseq (%p44_p12) }
  0x98   :  { %278 = vperm.xlu1 (%p44_p12), %1538, %v259_v3   ;;  %275 = vperm.xlu0 (%p44_p12), %1537, %v258_v4   ;;  %v1460_v18 = vpack.c.bf16 (%p44_p12), %v119_v17, %v117_v16  ;;  %v123_v22 = vld [vmem:[%s2770_s5 + $0x58] sm:$0xff] (%p44_p12)  ;;  %v150_v24 = vld [vmem:[%s2771_s6 + $0x20] sm:$0xff] (%p44_p12)  ;;  %v122_v28 = vld [vmem:[%s2770_s5 + $0x50] sm:$0xff] (%p44_p12) }
  0x99   :  { %1457 = vmatprep.subr.bf16.mxu0 (%p44_p12), %v1456_v14  ;;  %1489 = vmatprep.subr.bf16.mxu1 (%p44_p12), %v1456_v14  ;;  %v1464_v26 = vpack.c.bf16 (%p44_p12), %v123_v22, %v121_v21  ;;  %v120_v27 = vld [vmem:[%s2770_s5 + $0x40] sm:$0xff] (%p44_p12)  ;;  %v125_v29 = vld [vmem:[%s2770_s5 + $0x68] sm:$0xff] (%p44_p12)  ;;  %v127_v30 = vld [vmem:[%s2770_s5 + $0x78] sm:$0xff] (%p44_p12)  ;;  %v2095_v20 = vand.u32 (%p44_p12), 127, %v2778_v19 }
  0x9a   :  { %1459 = vmatpush1.bf16.msra.mxu0 %v1458_v15  ;;  %1491 = vmatpush1.bf16.msra.mxu1 %v1458_v15  ;;  %v263_v31 = vld [vmem:[%s2772_s7 + $0x28] sm:$0xff]  ;;  %v1466_v33 = vpack.c.bf16 %v122_v28, %v120_v27  ;;  %v1468_v34 = vpack.c.bf16 %v127_v30, %v125_v29  ;;  %v124_v35 = vld [vmem:[%s2770_s5 + $0x60] sm:$0xff]  ;;  %v126_v36 = vld [vmem:[%s2770_s5 + $0x70] sm:$0xff] }
  0x9b   :  { %1461 = vmatprep.subr.bf16.mxu0 %v1460_v18  ;;  %1493 = vmatprep.subr.bf16.mxu1 %v1460_v18  ;;  %v151_v32 = vld [vmem:[%s2771_s6 + $0x28] sm:$0xff]  ;;  %v131_v38 = vld [vmem:[%s2770_s5 + $0x98] sm:$0xff]  ;;  %v264_v39 = vld [vmem:[%s2772_s7 + $0x30] sm:$0xff]  ;;  %v1470_v41 = vpack.c.bf16 %v126_v36, %v124_v35  ;;  %2801 = vst [vmem:[#allocation33_spill] sm:$0xff] %v2095_v20 }
  0x9c   :  { %281 = vperm.xlu1 %1538, %v260_v6   ;;  %169 = vperm.xlu0 %1537, %v148_v7   ;;  %v129_v37 = vld [vmem:[%s2770_s5 + $0x88] sm:$0xff]  ;;  %v152_v40 = vld [vmem:[%s2771_s6 + $0x30] sm:$0xff]  ;;  %v128_v43 = vld [vmem:[%s2770_s5 + $0x80] sm:$0xff] }
  0x9d   :  { %v1472_v42 = vpack.c.bf16 %v131_v38, %v129_v37  ;;  %v130_v44 = vld [vmem:[%s2770_s5 + $0x90] sm:$0xff]  ;;  %v133_v45 = vld [vmem:[%s2770_s5 + $0xa8] sm:$0xff]  ;;  %v135_v46 = vld [vmem:[%s2770_s5 + $0xb8] sm:$0xff] }
  0x9e   :  { %1463 = vmatpush1.bf16.msra.mxu0 %v1462_v25  ;;  %1495 = vmatpush1.bf16.msra.mxu1 %v1462_v25  ;;  %v265_v47 = vld [vmem:[%s2772_s7 + $0x38] sm:$0xff]  ;;  %v1474_v49 = vpack.c.bf16 %v130_v44, %v128_v43  ;;  %v1476_v50 = vpack.c.bf16 %v135_v46, %v133_v45  ;;  %v132_v51 = vld [vmem:[%s2770_s5 + $0xa0] sm:$0xff]  ;;  %v134_v52 = vld [vmem:[%s2770_s5 + $0xb0] sm:$0xff] }
  0x9f   :  { %1465 = vmatprep.subr.bf16.mxu0 %v1464_v26  ;;  %1497 = vmatprep.subr.bf16.mxu1 %v1464_v26  ;;  %v153_v48 = vld [vmem:[%s2771_s6 + $0x38] sm:$0xff]  ;;  %v137_v53 = vld [vmem:[%s2770_s5 + $0xc8] sm:$0xff]  ;;  %v266_v55 = vld [vmem:[%s2772_s7 + $0x40] sm:$0xff]  ;;  %v1478_v57 = vpack.c.bf16 %v134_v52, %v132_v51 }
  0xa0   :  { %284 = vperm.xlu1 %1538, %v261_v8   ;;  %172 = vperm.xlu0 %1537, %v149_v9   ;;  %v139_v54 = vld [vmem:[%s2770_s5 + $0xd8] sm:$0xff]  ;;  %v154_v56 = vld [vmem:[%s2771_s6 + $0x40] sm:$0xff]  ;;  %v138_v60 = vld [vmem:[%s2770_s5 + $0xd0] sm:$0xff] }
  0xa1   :  { %v1480_v58 = vpack.c.bf16 %v139_v54, %v137_v53  ;;  %v136_v59 = vld [vmem:[%s2770_s5 + $0xc0] sm:$0xff]  ;;  %v141_v61 = vld [vmem:[%s2770_s5 + $0xe8] sm:$0xff]  ;;  %v143_v62 = vld [vmem:[%s2770_s5 + $0xf8] sm:$0xff] }
  0xa2   :  { %1467 = vmatpush1.bf16.msra.mxu0 %v1466_v33  ;;  %1499 = vmatpush1.bf16.msra.mxu1 %v1466_v33  ;;  %v267_v63 = vld [vmem:[%s2772_s7 + $0x48] sm:$0xff]  ;;  %v1482_v1 = vpack.c.bf16 %v138_v60, %v136_v59  ;;  %v1484_v2 = vpack.c.bf16 %v143_v62, %v141_v61  ;;  %v140_v3 = vld [vmem:[%s2770_s5 + $0xe0] sm:$0xff]  ;;  %v142_v4 = vld [vmem:[%s2770_s5 + $0xf0] sm:$0xff] }
  0xa3   :  { %1469 = vmatprep.subr.bf16.mxu0 %v1468_v34  ;;  %1501 = vmatprep.subr.bf16.mxu1 %v1468_v34  ;;  %v155_v0 = vld [vmem:[%s2771_s6 + $0x48] sm:$0xff]  ;;  %v268_v6 = vld [vmem:[%s2772_s7 + $0x50] sm:$0xff]  ;;  %v1486_v8 = vpack.c.bf16 %v142_v4, %v140_v3  ;;  %v269_v9 = vld [vmem:[%s2772_s7 + $0x58] sm:$0xff] }
  0xa4   :  { %287 = vperm.xlu1 %1538, %v262_v23   ;;  %175 = vperm.xlu0 %1537, %v150_v24   ;;  %v156_v7 = vld [vmem:[%s2771_s6 + $0x50] sm:$0xff]  ;;  %v157_v10 = vld [vmem:[%s2771_s6 + $0x58] sm:$0xff]  ;;  %v270_v11 = vld [vmem:[%s2772_s7 + $0x60] sm:$0xff]  ;;  %v1759_v23 = vmov 1.0  }
  0xa5   :  { %v158_v12 = vld [vmem:[%s2771_s6 + $0x60] sm:$0xff]  ;;  %v271_v13 = vld [vmem:[%s2772_s7 + $0x68] sm:$0xff]  ;;  %v272_v15 = vld [vmem:[%s2772_s7 + $0x70] sm:$0xff] }
  0xa6   :  { %1471 = vmatpush1.bf16.msra.mxu0 %v1470_v41  ;;  %1503 = vmatpush1.bf16.msra.mxu1 %v1470_v41  ;;  %v159_v14 = vld [vmem:[%s2771_s6 + $0x68] sm:$0xff]  ;;  %v160_v16 = vld [vmem:[%s2771_s6 + $0x70] sm:$0xff]  ;;  %v273_v17 = vld [vmem:[%s2772_s7 + $0x78] sm:$0xff] }
  0xa7   :  { %1473 = vmatprep.subr.bf16.mxu0 %v1472_v42  ;;  %1505 = vmatprep.subr.bf16.mxu1 %v1472_v42  ;;  %v161_v18 = vld [vmem:[%s2771_s6 + $0x78] sm:$0xff] }
  0xa8   :  { %290 = vperm.xlu1 %1538, %v263_v31   ;;  %178 = vperm.xlu0 %1537, %v151_v32  }
  0xaa   :  { %1475 = vmatpush1.bf16.msra.mxu0 %v1474_v49  ;;  %1507 = vmatpush1.bf16.msra.mxu1 %v1474_v49 }
  0xab   :  { %1477 = vmatprep.subr.bf16.mxu0 %v1476_v50  ;;  %1509 = vmatprep.subr.bf16.mxu1 %v1476_v50 }
  0xac   :  { %293 = vperm.xlu1 %1538, %v264_v39   ;;  %181 = vperm.xlu0 %1537, %v152_v40  }
  0xae   :  { %1479 = vmatpush1.bf16.msra.mxu0 %v1478_v57  ;;  %1511 = vmatpush1.bf16.msra.mxu1 %v1478_v57 }
  0xaf   :  { %1481 = vmatprep.subr.bf16.mxu0 %v1480_v58  ;;  %1513 = vmatprep.subr.bf16.mxu1 %v1480_v58 }
  0xb0   :  { %296 = vperm.xlu1 %1538, %v265_v47   ;;  %184 = vperm.xlu0 %1537, %v153_v48  }
  0xb2   :  { %1483 = vmatpush1.bf16.msra.mxu0 %v1482_v1  ;;  %1515 = vmatpush1.bf16.msra.mxu1 %v1482_v1 }
  0xb3   :  { %1485 = vmatprep.subr.bf16.mxu0 %v1484_v2  ;;  %1517 = vmatprep.subr.bf16.mxu1 %v1484_v2 }
  0xb4   :  { %299 = vperm.xlu1 %1538, %v266_v55   ;;  %187 = vperm.xlu0 %1537, %v154_v56  }
  0xb6   :  { %1487 = vmatpush1.bf16.msra.mxu0 %v1486_v8  ;;  %1519 = vmatpush1.bf16.msra.mxu1 %v1486_v8 }
  0xb8   :  { %302 = vperm.xlu1 %1538, %v267_v63   ;;  %190 = vperm.xlu0 %1537, %v155_v0  }
  0xbc   :  { %305 = vperm.xlu1 %1538, %v268_v6   ;;  %193 = vperm.xlu0 %1537, %v156_v7  }
  0xc0   :  { %308 = vperm.xlu1 %1538, %v269_v9   ;;  %196 = vperm.xlu0 %1537, %v157_v10  }
  0xc4   :  { %311 = vperm.xlu1 %1538, %v270_v11   ;;  %199 = vperm.xlu0 %1537, %v158_v12  }
  0xc8   :  { %314 = vperm.xlu1 %1538, %v271_v13   ;;  %202 = vperm.xlu0 %1537, %v159_v14  }
  0xcc   :  { %317 = vperm.xlu1 %1538, %v272_v15   ;;  %205 = vperm.xlu0 %1537, %v160_v16  }
  0xd0   :  { %320 = vperm.xlu1 %1538, %v273_v17   ;;  %208 = vperm.xlu0 %1537, %v161_v18  }
 0x113   :  { %v167_v21 = vpop.permute.xlu1 %166  ;;  %v164_v22 = vpop.permute.xlu0 %163 }
 0x114   :  { %vm210_vm0 = vcmp.eq.s32.totalorder %v164_v22, %v2095_v20  ;;  %vm211_vm1 = vcmp.eq.s32.totalorder %v167_v21, %v2095_v20 }
 0x115   :  { %1420 = vmatmul.mubr.msk.f32.vlgmr.msra.gmra.mrb[0].mxu0 %vm210_vm0, %v1759_v23 }
 0x116   :  { %440 = vmatprep.mubr.f32.mxu0 %v1758_v5 }
 0x117   :  { %v279_v24 = vpop.permute.xlu1 %278  ;;  %v276_v25 = vpop.permute.xlu0 %275 }
 0x118   :  { %vm322_vm2 = vcmp.eq.s32.totalorder %v276_v25, %v2095_v20  ;;  %vm323_vm3 = vcmp.eq.s32.totalorder %v279_v24, %v2095_v20 }
 0x119   :  { %1421 = vmatmul.mubr.msk.f32.gmra.mrb[2].mxu0 %vm211_vm1, %v1759_v23  ;;  %1436 = vmatmul.mubr.msk.f32.vlgmr.msra.gmra.mrb[0].mxu1 %vm322_vm2, %v1759_v23 }
 0x11a   :  { %446 = vmatprep.mubr.f32.mxu0 %v1758_v5  ;;  %601 = vmatprep.mubr.f32.mxu1 %v1758_v5 }
 0x11b   :  { %v282_v26 = vpop.permute.xlu1 %281  ;;  %v170_v27 = vpop.permute.xlu0 %169 }
 0x11c   :  { %vm212_vm4 = vcmp.eq.s32.totalorder %v170_v27, %v2095_v20  ;;  %vm324_vm5 = vcmp.eq.s32.totalorder %v282_v26, %v2095_v20 }
 0x11d   :  { %1422 = vmatmul.mubr.msk.f32.gmra.mrb[4].mxu0 %vm212_vm4, %v1759_v23  ;;  %1437 = vmatmul.mubr.msk.f32.gmra.mrb[2].mxu1 %vm323_vm3, %v1759_v23 }
 0x11e   :  { %452 = vmatprep.mubr.f32.mxu0 %v1758_v5  ;;  %607 = vmatprep.mubr.f32.mxu1 %v1758_v5 }
 0x11f   :  { %v285_v28 = vpop.permute.xlu1 %284  ;;  %v173_v29 = vpop.permute.xlu0 %172 }
 0x120   :  { %vm213_vm6 = vcmp.eq.s32.totalorder %v173_v29, %v2095_v20  ;;  %vm325_vm7 = vcmp.eq.s32.totalorder %v285_v28, %v2095_v20 }
 0x121   :  { %1423 = vmatmul.mubr.msk.f32.gmra.mrb[6].mxu0 %vm213_vm6, %v1759_v23  ;;  %1438 = vmatmul.mubr.msk.f32.gmra.mrb[4].mxu1 %vm324_vm5, %v1759_v23 }
 0x122   :  { %458 = vmatprep.mubr.f32.mxu0 %v1758_v5  ;;  %613 = vmatprep.mubr.f32.mxu1 %v1758_v5 }
 0x123   :  { %v288_v30 = vpop.permute.xlu1 %287  ;;  %v176_v31 = vpop.permute.xlu0 %175 }
 0x124   :  { %vm214_vm8 = vcmp.eq.s32.totalorder %v176_v31, %v2095_v20  ;;  %vm326_vm9 = vcmp.eq.s32.totalorder %v288_v30, %v2095_v20 }
 0x125   :  { %1424 = vmatmul.mubr.msk.f32.gmra.mrb[8].mxu0 %vm214_vm8, %v1759_v23  ;;  %1439 = vmatmul.mubr.msk.f32.gmra.mrb[6].mxu1 %vm325_vm7, %v1759_v23 }
 0x126   :  { %464 = vmatprep.mubr.f32.mxu0 %v1758_v5  ;;  %619 = vmatprep.mubr.f32.mxu1 %v1758_v5 }
 0x127   :  { %v291_v32 = vpop.permute.xlu1 %290  ;;  %v179_v33 = vpop.permute.xlu0 %178 }
 0x128   :  { %vm215_vm10 = vcmp.eq.s32.totalorder %v179_v33, %v2095_v20  ;;  %vm327_vm11 = vcmp.eq.s32.totalorder %v291_v32, %v2095_v20 }
 0x129   :  { %1425 = vmatmul.mubr.msk.f32.gmra.mrb[10].mxu0 %vm215_vm10, %v1759_v23  ;;  %1440 = vmatmul.mubr.msk.f32.gmra.mrb[8].mxu1 %vm326_vm9, %v1759_v23 }
 0x12a   :  { %470 = vmatprep.mubr.f32.mxu0 %v1758_v5  ;;  %625 = vmatprep.mubr.f32.mxu1 %v1758_v5 }
 0x12b   :  { %v294_v34 = vpop.permute.xlu1 %293  ;;  %v182_v35 = vpop.permute.xlu0 %181 }
 0x12c   :  { %vm216_vm12 = vcmp.eq.s32.totalorder %v182_v35, %v2095_v20  ;;  %vm328_vm13 = vcmp.eq.s32.totalorder %v294_v34, %v2095_v20 }
 0x12d   :  { %1426 = vmatmul.mubr.msk.f32.gmra.mrb[12].mxu0 %vm216_vm12, %v1759_v23  ;;  %1441 = vmatmul.mubr.msk.f32.gmra.mrb[10].mxu1 %vm327_vm11, %v1759_v23 }
 0x12e   :  { %476 = vmatprep.mubr.f32.mxu0 %v1758_v5  ;;  %631 = vmatprep.mubr.f32.mxu1 %v1758_v5 }
 0x12f   :  { %v297_v36 = vpop.permute.xlu1 %296  ;;  %v185_v37 = vpop.permute.xlu0 %184 }
 0x130   :  { %vm217_vm14 = vcmp.eq.s32.totalorder %v185_v37, %v2095_v20  ;;  %vm329_vm15 = vcmp.eq.s32.totalorder %v297_v36, %v2095_v20 }
 0x131   :  { %1427 = vmatmul.mubr.msk.f32.gmra.mrb[14].mxu0 %vm217_vm14, %v1759_v23  ;;  %1442 = vmatmul.mubr.msk.f32.gmra.mrb[12].mxu1 %vm328_vm13, %v1759_v23 }
 0x132   :  { %482 = vmatprep.mubr.f32.mxu0 %v1758_v5  ;;  %637 = vmatprep.mubr.f32.mxu1 %v1758_v5 }
 0x133   :  { %v300_v38 = vpop.permute.xlu1 %299  ;;  %v188_v39 = vpop.permute.xlu0 %187 }
 0x134   :  { %vm218_vm0 = vcmp.eq.s32.totalorder %v188_v39, %v2095_v20  ;;  %vm330_vm1 = vcmp.eq.s32.totalorder %v300_v38, %v2095_v20 }
 0x135   :  { %1428 = vmatmul.mubr.msk.f32.gmra.mrb[16].mxu0 %vm218_vm0, %v1759_v23  ;;  %1443 = vmatmul.mubr.msk.f32.gmra.mrb[14].mxu1 %vm329_vm15, %v1759_v23 }
 0x136   :  { %488 = vmatprep.mubr.f32.mxu0 %v1758_v5  ;;  %643 = vmatprep.mubr.f32.mxu1 %v1758_v5 }
 0x137   :  { %v303_v40 = vpop.permute.xlu1 %302  ;;  %v191_v41 = vpop.permute.xlu0 %190 }
 0x138   :  { %vm219_vm2 = vcmp.eq.s32.totalorder %v191_v41, %v2095_v20  ;;  %vm331_vm3 = vcmp.eq.s32.totalorder %v303_v40, %v2095_v20 }
 0x139   :  { %1429 = vmatmul.mubr.msk.f32.gmra.mrb[18].mxu0 %vm219_vm2, %v1759_v23  ;;  %1444 = vmatmul.mubr.msk.f32.gmra.mrb[16].mxu1 %vm330_vm1, %v1759_v23 }
 0x13a   :  { %494 = vmatprep.mubr.f32.mxu0 %v1758_v5  ;;  %649 = vmatprep.mubr.f32.mxu1 %v1758_v5 }
 0x13b   :  { %v306_v42 = vpop.permute.xlu1 %305  ;;  %v194_v43 = vpop.permute.xlu0 %193 }
 0x13c   :  { %vm220_vm4 = vcmp.eq.s32.totalorder %v194_v43, %v2095_v20  ;;  %vm332_vm5 = vcmp.eq.s32.totalorder %v306_v42, %v2095_v20 }
 0x13d   :  { %1430 = vmatmul.mubr.msk.f32.gmra.mrb[20].mxu0 %vm220_vm4, %v1759_v23  ;;  %1445 = vmatmul.mubr.msk.f32.gmra.mrb[18].mxu1 %vm331_vm3, %v1759_v23 }
 0x13e   :  { %500 = vmatprep.mubr.f32.mxu0 %v1758_v5  ;;  %655 = vmatprep.mubr.f32.mxu1 %v1758_v5 }
 0x13f   :  { %v309_v44 = vpop.permute.xlu1 %308  ;;  %v197_v45 = vpop.permute.xlu0 %196 }
 0x140   :  { %vm221_vm6 = vcmp.eq.s32.totalorder %v197_v45, %v2095_v20  ;;  %vm333_vm7 = vcmp.eq.s32.totalorder %v309_v44, %v2095_v20 }
 0x141   :  { %1431 = vmatmul.mubr.msk.f32.gmra.mrb[22].mxu0 %vm221_vm6, %v1759_v23  ;;  %1446 = vmatmul.mubr.msk.f32.gmra.mrb[20].mxu1 %vm332_vm5, %v1759_v23 }
 0x142   :  { %506 = vmatprep.mubr.f32.mxu0 %v1758_v5  ;;  %661 = vmatprep.mubr.f32.mxu1 %v1758_v5 }
 0x143   :  { %v312_v46 = vpop.permute.xlu1 %311  ;;  %v200_v47 = vpop.permute.xlu0 %199 }
 0x144   :  { %vm222_vm8 = vcmp.eq.s32.totalorder %v200_v47, %v2095_v20  ;;  %vm334_vm9 = vcmp.eq.s32.totalorder %v312_v46, %v2095_v20 }
 0x145   :  { %1432 = vmatmul.mubr.msk.f32.gmra.mrb[24].mxu0 %vm222_vm8, %v1759_v23  ;;  %1447 = vmatmul.mubr.msk.f32.gmra.mrb[22].mxu1 %vm333_vm7, %v1759_v23 }
 0x146   :  { %512 = vmatprep.mubr.f32.mxu0 %v1758_v5  ;;  %667 = vmatprep.mubr.f32.mxu1 %v1758_v5 }
 0x147   :  { %v315_v48 = vpop.permute.xlu1 %314  ;;  %v203_v49 = vpop.permute.xlu0 %202 }
 0x148   :  { %vm223_vm10 = vcmp.eq.s32.totalorder %v203_v49, %v2095_v20  ;;  %vm335_vm11 = vcmp.eq.s32.totalorder %v315_v48, %v2095_v20 }
 0x149   :  { %1433 = vmatmul.mubr.msk.f32.gmra.mrb[26].mxu0 %vm223_vm10, %v1759_v23  ;;  %1448 = vmatmul.mubr.msk.f32.gmra.mrb[24].mxu1 %vm334_vm9, %v1759_v23 }
 0x14a   :  { %518 = vmatprep.mubr.f32.mxu0 %v1758_v5  ;;  %673 = vmatprep.mubr.f32.mxu1 %v1758_v5 }
 0x14b   :  { %v318_v50 = vpop.permute.xlu1 %317  ;;  %v206_v51 = vpop.permute.xlu0 %205 }
 0x14c   :  { %vm224_vm12 = vcmp.eq.s32.totalorder %v206_v51, %v2095_v20  ;;  %vm336_vm13 = vcmp.eq.s32.totalorder %v318_v50, %v2095_v20 }
 0x14d   :  { %1434 = vmatmul.mubr.msk.f32.gmra.mrb[28].mxu0 %vm224_vm12, %v1759_v23  ;;  %1449 = vmatmul.mubr.msk.f32.gmra.mrb[26].mxu1 %vm335_vm11, %v1759_v23 }
 0x14e   :  { %524 = vmatprep.mubr.f32.mxu0 %v1758_v5  ;;  %679 = vmatprep.mubr.f32.mxu1 %v1758_v5 }
 0x14f   :  { %v209_v52 = vpop.permute.xlu0 %208  ;;  %v321_v53 = vpop.permute.xlu1 %320 }
 0x150   :  { %vm225_vm14 = vcmp.eq.s32.totalorder %v209_v52, %v2095_v20  ;;  %vm337_vm15 = vcmp.eq.s32.totalorder %v321_v53, %v2095_v20 }
 0x151   :  { %1435 = vmatmul.mubr.msk.f32.gmra.mrb[30].mxu0 %vm225_vm14, %v1759_v23  ;;  %1450 = vmatmul.mubr.msk.f32.gmra.mrb[28].mxu1 %vm336_vm13, %v1759_v23 }
 0x152   :  { %685 = vmatprep.mubr.f32.mxu1 %v1758_v5 }
 0x155   :  { %1451 = vmatmul.mubr.msk.f32.gmra.mrb[30].mxu1 %vm337_vm15, %v1759_v23 }
 0x1e8   :  { %v2191_v54 = vpop.f32.mrb[0].mxu0 }
 0x1e9   :  { %v2193_v55 = vpop.f32.mrb[1].mxu0 }
 0x1ec   :  { %v2195_v56 = vpop.f32.mrb[2].mxu0  ;;  %v2197_v57 = vpop.f32.mrb[0].mxu1 }
 0x1ed   :  { %v2199_v58 = vpop.f32.mrb[3].mxu0  ;;  %v2201_v59 = vpop.f32.mrb[1].mxu1 }
 0x1f0   :  { %v2203_v60 = vpop.f32.mrb[4].mxu0  ;;  %v2205_v61 = vpop.f32.mrb[2].mxu1 }
 0x1f1   :  { %v2207_v5 = vpop.f32.mrb[5].mxu0  ;;  %v2209_v62 = vpop.f32.mrb[3].mxu1 }
 0x1f4   :  { %v2211_v63 = vpop.f32.mrb[6].mxu0  ;;  %v2213_v0 = vpop.f32.mrb[4].mxu1 }
 0x1f5   :  { %v2215_v1 = vpop.f32.mrb[7].mxu0  ;;  %v2217_v2 = vpop.f32.mrb[5].mxu1 }
 0x1f8   :  { %v2219_v3 = vpop.f32.mrb[8].mxu0  ;;  %v2221_v4 = vpop.f32.mrb[6].mxu1 }
 0x1f9   :  { %2802 = vst [vmem:[#allocation34_spill] sm:$0xff] %v2219_v3  ;;  %v2223_v6 = vpop.f32.mrb[9].mxu0  ;;  %v2225_v7 = vpop.f32.mrb[7].mxu1 }
 0x1fa   :  { %2803 = vst [vmem:[#allocation35_spill] sm:$0xff] %v2223_v6  ;;  %2804 = vst [vmem:[#allocation36_spill] sm:$0xff] %v2225_v7 }
 0x1fc   :  { %v2227_v8 = vpop.f32.mrb[10].mxu0  ;;  %v2229_v9 = vpop.f32.mrb[8].mxu1 }
 0x1fd   :  { %2805 = vst [vmem:[#allocation37_spill] sm:$0xff] %v2227_v8  ;;  %2806 = vst [vmem:[#allocation38_spill] sm:$0xff] %v2229_v9  ;;  %v2231_v10 = vpop.f32.mrb[11].mxu0  ;;  %v2233_v11 = vpop.f32.mrb[9].mxu1 }
 0x1fe   :  { %2807 = vst [vmem:[#allocation39_spill] sm:$0xff] %v2231_v10  ;;  %2808 = vst [vmem:[#allocation40_spill] sm:$0xff] %v2233_v11 }
 0x200   :  { %v2235_v12 = vpop.f32.mrb[12].mxu0  ;;  %v2237_v13 = vpop.f32.mrb[10].mxu1 }
 0x201   :  { %2809 = vst [vmem:[#allocation41_spill] sm:$0xff] %v2235_v12  ;;  %2810 = vst [vmem:[#allocation42_spill] sm:$0xff] %v2237_v13  ;;  %v2239_v14 = vpop.f32.mrb[13].mxu0  ;;  %v2241_v15 = vpop.f32.mrb[11].mxu1 }
 0x202   :  { %2811 = vst [vmem:[#allocation43_spill] sm:$0xff] %v2239_v14  ;;  %2812 = vst [vmem:[#allocation44_spill] sm:$0xff] %v2241_v15 }
 0x204   :  { %v2243_v16 = vpop.f32.mrb[14].mxu0  ;;  %v2245_v17 = vpop.f32.mrb[12].mxu1 }
 0x205   :  { %2813 = vst [vmem:[#allocation45_spill] sm:$0xff] %v2243_v16  ;;  %2814 = vst [vmem:[#allocation46_spill] sm:$0xff] %v2245_v17  ;;  %v2247_v18 = vpop.f32.mrb[15].mxu0  ;;  %v2249_v21 = vpop.f32.mrb[13].mxu1 }
 0x206   :  { %2815 = vst [vmem:[#allocation47_spill] sm:$0xff] %v2247_v18  ;;  %2816 = vst [vmem:[#allocation48_spill] sm:$0xff] %v2249_v21 }
 0x208   :  { %v2251_v22 = vpop.f32.mrb[16].mxu0  ;;  %v2253_v23 = vpop.f32.mrb[14].mxu1 }
 0x209   :  { %2817 = vst [vmem:[#allocation49_spill] sm:$0xff] %v2251_v22  ;;  %2818 = vst [vmem:[#allocation50_spill] sm:$0xff] %v2253_v23  ;;  %v2255_v24 = vpop.f32.mrb[17].mxu0  ;;  %v2257_v25 = vpop.f32.mrb[15].mxu1 }
 0x20a   :  { %2819 = vst [vmem:[#allocation51_spill] sm:$0xff] %v2255_v24  ;;  %2820 = vst [vmem:[#allocation52_spill] sm:$0xff] %v2257_v25 }
 0x20c   :  { %v2259_v26 = vpop.f32.mrb[18].mxu0  ;;  %v2261_v27 = vpop.f32.mrb[16].mxu1 }
 0x20d   :  { %2821 = vst [vmem:[#allocation53_spill] sm:$0xff] %v2259_v26  ;;  %2822 = vst [vmem:[#allocation54_spill] sm:$0xff] %v2261_v27  ;;  %v2263_v28 = vpop.f32.mrb[19].mxu0  ;;  %v2265_v29 = vpop.f32.mrb[17].mxu1 }
 0x20e   :  { %2823 = vst [vmem:[#allocation55_spill] sm:$0xff] %v2263_v28  ;;  %2824 = vst [vmem:[#allocation56_spill] sm:$0xff] %v2265_v29 }
 0x210   :  { %v2267_v30 = vpop.f32.mrb[20].mxu0  ;;  %v2269_v31 = vpop.f32.mrb[18].mxu1 }
 0x211   :  { %2825 = vst [vmem:[#allocation57_spill] sm:$0xff] %v2267_v30  ;;  %2826 = vst [vmem:[#allocation58_spill] sm:$0xff] %v2269_v31  ;;  %v2271_v32 = vpop.f32.mrb[21].mxu0  ;;  %v2273_v33 = vpop.f32.mrb[19].mxu1 }
 0x212   :  { %2827 = vst [vmem:[#allocation59_spill] sm:$0xff] %v2271_v32  ;;  %2828 = vst [vmem:[#allocation60_spill] sm:$0xff] %v2273_v33 }
 0x214   :  { %v2275_v34 = vpop.f32.mrb[22].mxu0  ;;  %v2277_v35 = vpop.f32.mrb[20].mxu1 }
 0x215   :  { %2829 = vst [vmem:[#allocation61_spill] sm:$0xff] %v2275_v34  ;;  %2830 = vst [vmem:[#allocation62_spill] sm:$0xff] %v2277_v35  ;;  %v2279_v36 = vpop.f32.mrb[23].mxu0  ;;  %v2281_v37 = vpop.f32.mrb[21].mxu1 }
 0x216   :  { %2831 = vst [vmem:[#allocation63_spill] sm:$0xff] %v2279_v36  ;;  %2832 = vst [vmem:[#allocation64_spill] sm:$0xff] %v2281_v37 }
 0x218   :  { %v2283_v38 = vpop.f32.mrb[24].mxu0  ;;  %v2285_v39 = vpop.f32.mrb[22].mxu1 }
 0x219   :  { %2833 = vst [vmem:[#allocation65_spill] sm:$0xff] %v2283_v38  ;;  %2834 = vst [vmem:[#allocation66_spill] sm:$0xff] %v2285_v39  ;;  %v2287_v40 = vpop.f32.mrb[25].mxu0  ;;  %v2289_v41 = vpop.f32.mrb[23].mxu1 }
 0x21a   :  { %2835 = vst [vmem:[#allocation67_spill] sm:$0xff] %v2287_v40  ;;  %2836 = vst [vmem:[#allocation68_spill] sm:$0xff] %v2289_v41 }
 0x21c   :  { %v2291_v42 = vpop.f32.mrb[26].mxu0  ;;  %v2293_v43 = vpop.f32.mrb[24].mxu1 }
 0x21d   :  { %2837 = vst [vmem:[#allocation69_spill] sm:$0xff] %v2291_v42  ;;  %2838 = vst [vmem:[#allocation70_spill] sm:$0xff] %v2293_v43  ;;  %v2295_v44 = vpop.f32.mrb[27].mxu0  ;;  %v2297_v45 = vpop.f32.mrb[25].mxu1 }
 0x21e   :  { %2839 = vst [vmem:[#allocation71_spill] sm:$0xff] %v2297_v45 }
 0x220   :  { %v2299_v46 = vpop.f32.mrb[28].mxu0  ;;  %v2301_v47 = vpop.f32.mrb[26].mxu1 }
 0x221   :  { %2840 = vst [vmem:[#allocation72_spill] sm:$0xff] %v2299_v46  ;;  %2841 = vst [vmem:[#allocation73_spill] sm:$0xff] %v2301_v47  ;;  %v2303_v48 = vpop.f32.mrb[29].mxu0  ;;  %v2305_v49 = vpop.f32.mrb[27].mxu1 }
 0x224   :  { %v2307_v50 = vpop.f32.mrb[30].mxu0  ;;  %v2309_v51 = vpop.f32.mrb[28].mxu1 }
 0x225   :  { %2842 = vst [vmem:[#allocation74_spill] sm:$0xff] %v2307_v50  ;;  %2843 = vst [vmem:[#allocation75_spill] sm:$0xff] %v2309_v51  ;;  %v2311_v52 = vpop.f32.mrb[31].mxu0  ;;  %v2313_v53 = vpop.f32.mrb[29].mxu1 }
 0x228   :  { %v2315_v19 = vpop.f32.mrb[30].mxu1 }
 0x229   :  { %2844 = vst [vmem:[#allocation76_spill] sm:$0xff] %v2315_v19  ;;  %v2317_v20 = vpop.f32.mrb[31].mxu1 }
 0x22a   :  { %2845 = vst [vmem:[#allocation77_spill] sm:$0xff] %v2317_v20 }
 0x22b   :  { %1733 = dma.done.wait [#allocation6], 2048 }
 0x22c   :  { %1734 = vsyncadd [#allocation6], 4294965248 }
 0x22d   :  { %1735 = dma.done.wait [#allocation6 + $0x1], 2048 }
 0x22e   :  { %1736 = vsyncadd [#allocation6 + $0x1], 4294965248 }
 0x22f   :  { %1737 = dma.done.wait [#allocation6 + $0x2], 2048 }
 0x230   :  { %1738 = vsyncadd [#allocation6 + $0x2], 4294965248 }
 0x231   :  { %1739 = dma.done.wait [#allocation6 + $0x3], 2048 }
 0x232   :  { %1740 = vsyncadd [#allocation6 + $0x3], 4294965248  ;;  %v704_v46 = vld [vmem:[#allocation2] sm:$0xff]  ;;  %v705_v43 = vld [vmem:[#allocation2 + $0x8] sm:$0xff]  ;;  %vm1113_vm0 = vcmask 130112   ;;  %vm1120_vm1 = vcmask 195712  }
 0x233   :  { %v720_v50 = vld [vmem:[#allocation3] sm:$0xff]  ;;  %v721_v38 = vld [vmem:[#allocation3 + $0x8] sm:$0xff]  ;;  %v706_v30 = vld [vmem:[#allocation2 + $0x10] sm:$0xff]  ;;  %vm1127_vm2 = vcmask 261312   ;;  %vm1134_vm3 = vcmask 326912   ;;  %vm1141_vm4 = vcmask 392512  }
 0x234   :  { %v896_v47 = vld [vmem:[#allocation4] sm:$0xff]  ;;  %v2319_v51 = vsub.f32 %v704_v46, %v720_v50  ;;  %v2323_v19 = vsub.f32 %v705_v43, %v721_v38  ;;  %v897_v34 = vld [vmem:[#allocation4 + $0x8] sm:$0xff]  ;;  %v722_v27 = vld [vmem:[#allocation3 + $0x10] sm:$0xff]  ;;  %vm1148_vm5 = vcmask 458112   ;;  %vm1155_vm6 = vcmask 523712   ;;  %s1760_s6 = smov [#allocation12]  }
 0x235   :  { %v912_v42 = vld [vmem:[#allocation5] sm:$0xff]  ;;  %v913_v35 = vld [vmem:[#allocation5 + $0x8] sm:$0xff]  ;;  %v898_v22 = vld [vmem:[#allocation4 + $0x10] sm:$0xff]  ;;  %v2333_v38 = vsub.f32 %v706_v30, %v722_v27  ;;  %vm1162_vm7 = vcmask 589312   ;;  %vm1169_vm8 = vcmask 654912   ;;  %vm1176_vm9 = vcmask 720512  }
 0x236   :  { %v2321_v39 = vsub.f32 %v896_v47, %v912_v42  ;;  %v768_v31 = vmul.f32 %v2319_v51, %v2193_v55  ;;  %v2327_v26 = vsub.f32 %v897_v34, %v913_v35  ;;  %v914_v23 = vld [vmem:[#allocation5 + $0x10] sm:$0xff]  ;;  %v769_v42 = vmul.f32 %v2323_v19, %v2199_v58  ;;  %v707_v34 = vld [vmem:[#allocation2 + $0x18] sm:$0xff]  ;;  %v724_v12 = vld [vmem:[#allocation3 + $0x20] sm:$0xff]  ;;  %s1318_s7 = sshll.u32 %s1760_s6, 4  ;;  %s1761_s0 = smov [#allocation14]   ;;  %s1319_s7 = int_to_ptr.vmem [resolvable:$true] %s1318_s7 }
 0x237   :  { %v2337_v47 = vsub.f32 %v898_v22, %v914_v23  ;;  %v723_v35 = vld [vmem:[#allocation3 + $0x18] sm:$0xff]  ;;  %v770_v17 = vmul.f32 %v2333_v38, %v2207_v5  ;;  %v900_v22 = vld [vmem:[#allocation4 + $0x20] sm:$0xff]  ;;  %v725_v8 = vld [vmem:[#allocation3 + $0x28] sm:$0xff]  ;;  %vm1183_vm10 = vcmask 786112   ;;  %vm1190_vm11 = vcmask 851712   ;;  %s1328_s1 = sshll.u32 %s1761_s0, 4  ;;  %p1688_p0 = scmp.lt.s32.totalorder %s1319_s7, %s1319_s7  ;;  %s1329_s1 = int_to_ptr.vmem [resolvable:$true] %s1328_s1 }
 0x238   :  { %v960_v46 = vmul.f32 %v2321_v39, %v2201_v59  ;;  %784 = vadd.xlane.f32.xlu0 %v768_v31  ;;  %v961_v43 = vmul.f32 %v2327_v26, %v2209_v62  ;;  %v899_v50 = vld [vmem:[#allocation4 + $0x18] sm:$0xff]  ;;  %v2341_v31 = vsub.f32 %v707_v34, %v723_v35  ;;  %v916_v23 = vld [vmem:[#allocation5 + $0x20] sm:$0xff]  ;;  %v709_v35 = vld [vmem:[#allocation2 + $0x28] sm:$0xff]  ;;  %vm1197_vm12 = vcmask 917312   ;;  %s1683_s11 = scalar_lea.vmem %s1319_s7, 16  ;;  %s1687_s21 = scalar_lea.vmem %s1319_s7, 32 }
 0x239   :  { %v915_v16 = vld [vmem:[#allocation5 + $0x18] sm:$0xff]  ;;  %v962_v27 = vmul.f32 %v2337_v47, %v2217_v2  ;;  %v726_v3 = vld [vmem:[#allocation3 + $0x30] sm:$0xff]  ;;  %vm1204_vm13 = vcmask 982912   ;;  %vm1211_vm14 = vcmask 1048512   ;;  %p1684_p13 = scmp.ne.s32.totalorder %s1319_s7, %s1683_s11  ;;  %p1689_p1 = scmp.lt.s32.totalorder %s1687_s21, %s1683_s11 }
 0x23a   :  { %976 = vadd.xlane.f32.xlu1 %v960_v46  ;;  %v2345_v30 = vsub.f32 %v899_v50, %v915_v16  ;;  %v708_v46 = vld [vmem:[#allocation2 + $0x20] sm:$0xff]  ;;  %v771_v13 = vmul.f32 %v2341_v31, %v2215_v1  ;;  %v901_v16 = vld [vmem:[#allocation4 + $0x28] sm:$0xff] }
 0x23b   :  { %v917_v50 = vld [vmem:[#allocation5 + $0x28] sm:$0xff]  ;;  %p1690_p2 = por %p1689_p1, %p1688_p0 }
 0x23c   :  { %786 = vadd.xlane.f32.xlu0 %v769_v42  ;;  %v2349_v42 = vsub.f32 %v708_v46, %v724_v12  ;;  %v963_v34 = vmul.f32 %v2345_v30, %v2225_v7  ;;  %v710_v46 = vld [vmem:[#allocation2 + $0x30] sm:$0xff] }
 0x23d   :  { %p1691_p3 = pnand %p1690_p2, %p1684_p13 }
 0x23e   :  { %978 = vadd.xlane.f32.xlu1 %v961_v43  ;;  %v2353_v43 = vsub.f32 %v900_v22, %v916_v23  ;;  %v772_v9 = vmul.f32 %v2349_v42, %v2223_v6  ;;  %v902_v22 = vld [vmem:[#allocation4 + $0x30] sm:$0xff] }
 0x23f   :  { %v918_v23 = vld [vmem:[#allocation5 + $0x30] sm:$0xff] }
 0x240   :  { %788 = vadd.xlane.f32.xlu0 %v770_v17  ;;  %v2357_v17 = vsub.f32 %v709_v35, %v725_v8  ;;  %v964_v12 = vmul.f32 %v2353_v43, %v2233_v11  ;;  %v711_v35 = vld [vmem:[#allocation2 + $0x38] sm:$0xff] }
 0x241   :  { %v727_v11 = vld [vmem:[#allocation3 + $0x38] sm:$0xff] }
 0x242   :  { %980 = vadd.xlane.f32.xlu1 %v962_v27  ;;  %v2361_v27 = vsub.f32 %v901_v16, %v917_v50  ;;  %v773_v7 = vmul.f32 %v2357_v17, %v2231_v10  ;;  %v903_v16 = vld [vmem:[#allocation4 + $0x38] sm:$0xff] }
 0x243   :  { %v919_v50 = vld [vmem:[#allocation5 + $0x38] sm:$0xff] }
 0x244   :  { %790 = vadd.xlane.f32.xlu0 %v771_v13  ;;  %v2365_v13 = vsub.f32 %v710_v46, %v726_v3  ;;  %v965_v8 = vmul.f32 %v2361_v27, %v2241_v15  ;;  %v712_v46 = vld [vmem:[#allocation2 + $0x40] sm:$0xff] }
 0x245   :  { %v728_v15 = vld [vmem:[#allocation3 + $0x40] sm:$0xff] }
 0x246   :  { %982 = vadd.xlane.f32.xlu1 %v963_v34  ;;  %v2369_v34 = vsub.f32 %v902_v22, %v918_v23  ;;  %v774_v6 = vmul.f32 %v2365_v13, %v2239_v14  ;;  %v904_v22 = vld [vmem:[#allocation4 + $0x40] sm:$0xff] }
 0x247   :  { %v920_v23 = vld [vmem:[#allocation5 + $0x40] sm:$0xff] }
 0x248   :  { %792 = vadd.xlane.f32.xlu0 %v772_v9  ;;  %v2373_v9 = vsub.f32 %v711_v35, %v727_v11  ;;  %v966_v3 = vmul.f32 %v2369_v34, %v2249_v21  ;;  %v713_v35 = vld [vmem:[#allocation2 + $0x48] sm:$0xff] }
 0x249   :  { %v729_v21 = vld [vmem:[#allocation3 + $0x48] sm:$0xff] }
 0x24a   :  { %984 = vadd.xlane.f32.xlu1 %v964_v12  ;;  %v2377_v12 = vsub.f32 %v903_v16, %v919_v50  ;;  %v775_v10 = vmul.f32 %v2373_v9, %v2247_v18  ;;  %v905_v16 = vld [vmem:[#allocation4 + $0x48] sm:$0xff] }
 0x24b   :  { %v921_v50 = vld [vmem:[#allocation5 + $0x48] sm:$0xff] }
 0x24c   :  { %794 = vadd.xlane.f32.xlu0 %v773_v7  ;;  %v2381_v7 = vsub.f32 %v712_v46, %v728_v15  ;;  %v967_v11 = vmul.f32 %v2377_v12, %v2257_v25  ;;  %v714_v46 = vld [vmem:[#allocation2 + $0x50] sm:$0xff] }
 0x24d   :  { %v730_v25 = vld [vmem:[#allocation3 + $0x50] sm:$0xff] }
 0x24e   :  { %986 = vadd.xlane.f32.xlu1 %v965_v8  ;;  %v2385_v8 = vsub.f32 %v904_v22, %v920_v23  ;;  %v776_v14 = vmul.f32 %v2381_v7, %v2255_v24  ;;  %v906_v22 = vld [vmem:[#allocation4 + $0x50] sm:$0xff] }
 0x24f   :  { %v922_v23 = vld [vmem:[#allocation5 + $0x50] sm:$0xff] }
 0x250   :  { %796 = vadd.xlane.f32.xlu0 %v774_v6  ;;  %v2389_v6 = vsub.f32 %v713_v35, %v729_v21  ;;  %v968_v15 = vmul.f32 %v2385_v8, %v2265_v29  ;;  %v715_v35 = vld [vmem:[#allocation2 + $0x58] sm:$0xff] }
 0x251   :  { %v731_v29 = vld [vmem:[#allocation3 + $0x58] sm:$0xff] }
 0x252   :  { %988 = vadd.xlane.f32.xlu1 %v966_v3  ;;  %v2393_v3 = vsub.f32 %v905_v16, %v921_v50  ;;  %v777_v18 = vmul.f32 %v2389_v6, %v2263_v28  ;;  %v907_v16 = vld [vmem:[#allocation4 + $0x58] sm:$0xff] }
 0x253   :  { %v923_v50 = vld [vmem:[#allocation5 + $0x58] sm:$0xff] }
 0x254   :  { %798 = vadd.xlane.f32.xlu0 %v775_v10  ;;  %v2397_v10 = vsub.f32 %v714_v46, %v730_v25  ;;  %v969_v21 = vmul.f32 %v2393_v3, %v2273_v33  ;;  %v716_v46 = vld [vmem:[#allocation2 + $0x60] sm:$0xff] }
 0x255   :  { %v732_v33 = vld [vmem:[#allocation3 + $0x60] sm:$0xff] }
 0x256   :  { %990 = vadd.xlane.f32.xlu1 %v967_v11  ;;  %v2401_v11 = vsub.f32 %v906_v22, %v922_v23  ;;  %v778_v24 = vmul.f32 %v2397_v10, %v2271_v32  ;;  %v908_v22 = vld [vmem:[#allocation4 + $0x60] sm:$0xff] }
 0x257   :  { %v924_v23 = vld [vmem:[#allocation5 + $0x60] sm:$0xff] }
 0x258   :  { %800 = vadd.xlane.f32.xlu0 %v776_v14  ;;  %v2405_v14 = vsub.f32 %v715_v35, %v731_v29  ;;  %v970_v25 = vmul.f32 %v2401_v11, %v2281_v37  ;;  %v717_v35 = vld [vmem:[#allocation2 + $0x68] sm:$0xff] }
 0x259   :  { %v733_v37 = vld [vmem:[#allocation3 + $0x68] sm:$0xff] }
 0x25a   :  { %992 = vadd.xlane.f32.xlu1 %v968_v15  ;;  %v2409_v15 = vsub.f32 %v907_v16, %v923_v50  ;;  %v779_v28 = vmul.f32 %v2405_v14, %v2279_v36  ;;  %v909_v16 = vld [vmem:[#allocation4 + $0x68] sm:$0xff] }
 0x25b   :  { %v925_v50 = vld [vmem:[#allocation5 + $0x68] sm:$0xff] }
 0x25c   :  { %802 = vadd.xlane.f32.xlu0 %v777_v18  ;;  %v2413_v18 = vsub.f32 %v716_v46, %v732_v33  ;;  %v971_v29 = vmul.f32 %v2409_v15, %v2289_v41  ;;  %v718_v46 = vld [vmem:[#allocation2 + $0x70] sm:$0xff] }
 0x25d   :  { %v734_v41 = vld [vmem:[#allocation3 + $0x70] sm:$0xff] }
 0x25e   :  { %994 = vadd.xlane.f32.xlu1 %v969_v21  ;;  %v2417_v21 = vsub.f32 %v908_v22, %v924_v23  ;;  %v780_v32 = vmul.f32 %v2413_v18, %v2287_v40  ;;  %v910_v22 = vld [vmem:[#allocation4 + $0x70] sm:$0xff] }
 0x25f   :  { %v926_v23 = vld [vmem:[#allocation5 + $0x70] sm:$0xff] }
 0x260   :  { %804 = vadd.xlane.f32.xlu0 %v778_v24  ;;  %v2421_v24 = vsub.f32 %v717_v35, %v733_v37  ;;  %v972_v33 = vmul.f32 %v2417_v21, %v2297_v45  ;;  %v719_v35 = vld [vmem:[#allocation2 + $0x78] sm:$0xff] }
 0x261   :  { %v735_v45 = vld [vmem:[#allocation3 + $0x78] sm:$0xff] }
 0x262   :  { %996 = vadd.xlane.f32.xlu1 %v970_v25  ;;  %v2425_v25 = vsub.f32 %v909_v16, %v925_v50  ;;  %v781_v36 = vmul.f32 %v2421_v24, %v2295_v44  ;;  %v911_v16 = vld [vmem:[#allocation4 + $0x78] sm:$0xff] }
 0x263   :  { %v927_v50 = vld [vmem:[#allocation5 + $0x78] sm:$0xff] }
 0x264   :  { %806 = vadd.xlane.f32.xlu0 %v779_v28  ;;  %v2429_v28 = vsub.f32 %v718_v46, %v734_v41  ;;  %v973_v37 = vmul.f32 %v2425_v25, %v2305_v49 }
 0x266   :  { %998 = vadd.xlane.f32.xlu1 %v971_v29  ;;  %v2433_v29 = vsub.f32 %v910_v22, %v926_v23  ;;  %v782_v40 = vmul.f32 %v2429_v28, %v2303_v48  ;;  %v944_v23 = vadd.f32 %v2321_v39, %v2197_v57 }
 0x268   :  { %808 = vadd.xlane.f32.xlu0 %v780_v32  ;;  %v2437_v32 = vsub.f32 %v719_v35, %v735_v45  ;;  %v974_v41 = vmul.f32 %v2433_v29, %v2313_v53 }
 0x26a   :  { %1000 = vadd.xlane.f32.xlu1 %v972_v33  ;;  %v2441_v33 = vsub.f32 %v911_v16, %v927_v50  ;;  %v783_v46 = vmul.f32 %v2437_v32, %v2311_v52  ;;  %v753_v50 = vadd.f32 %v2323_v19, %v2195_v56  ;;  %v946_v19 = vadd.f32 %v2337_v47, %v2213_v0 }
 0x26c   :  { %810 = vadd.xlane.f32.xlu0 %v781_v36  ;;  %v975_v22 = vmul.f32 %v2441_v33, %v2317_v20  ;;  %v752_v36 = vadd.f32 %v2319_v51, %v2191_v54 }
 0x26e   :  { %1002 = vadd.xlane.f32.xlu1 %v973_v37 }
 0x270   :  { %812 = vadd.xlane.f32.xlu0 %v782_v40 }
 0x272   :  { %1004 = vadd.xlane.f32.xlu1 %v974_v41 }
 0x274   :  { %814 = vadd.xlane.f32.xlu0 %v783_v46  ;;  %v945_v46 = vadd.f32 %v2327_v26, %v2205_v61 }
 0x276   :  { %1006 = vadd.xlane.f32.xlu1 %v975_v22 }
 0x2c5   :  { %v785_v45 = vpop.xlane.xlu0 %784 }
 0x2c6   :  { %v816_v37 = vmul.f32 %v785_v45, %v2193_v55 }
 0x2c7   :  { %v977_v35 = vpop.xlane.xlu1 %976 }
 0x2c8   :  { %v1008_v40 = vmul.f32 %v977_v35, %v2201_v59  ;;  %v832_v16 = vsub.f32 %v752_v36, %v816_v37  ;;  %v754_v59 = vadd.f32 %v2333_v38, %v2203_v60  ;;  %v947_v38 = vadd.f32 %v2345_v30, %v2221_v4  ;;  %v2846_v35 = vld [vmem:[#allocation36_spill] sm:$0xff] }
 0x2c9   :  { %v787_v41 = vpop.xlane.xlu0 %786 }
 0x2ca   :  { %v1024_v20 = vsub.f32 %v944_v23, %v1008_v40  ;;  %v817_v54 = vmul.f32 %v787_v41, %v2199_v58  ;;  %v848_v51 = vand.u32 2147483647, %v832_v16 }
 0x2cb   :  { %v979_v22 = vpop.xlane.xlu1 %978 }
 0x2cc   :  { %v1009_v57 = vmul.f32 %v979_v22, %v2209_v62  ;;  %864 = vadd.xlane.f32.xlu0 %v848_v51  ;;  %v833_v55 = vsub.f32 %v753_v50, %v817_v54  ;;  %v1040_v39 = vand.u32 2147483647, %v1024_v20  ;;  %v755_v20 = vadd.f32 %v2341_v31, %v2211_v63  ;;  %v2847_v50 = vld [vmem:[#allocation34_spill] sm:$0xff]  ;;  %v2849_v51 = vld [vmem:[#allocation35_spill] sm:$0xff]  ;;  %v2850_v22 = vld [vmem:[#allocation40_spill] sm:$0xff] }
 0x2cd   :  { %v789_v36 = vpop.xlane.xlu0 %788  ;;  %v756_v41 = vadd.f32 %v2349_v42, %v2847_v50  ;;  %v2848_v31 = vld [vmem:[#allocation38_spill] sm:$0xff] }
 0x2ce   :  { %v1025_v45 = vsub.f32 %v945_v46, %v1009_v57  ;;  %v818_v56 = vmul.f32 %v789_v36, %v2207_v5  ;;  %v849_v61 = vand.u32 2147483647, %v833_v55  ;;  %v948_v54 = vadd.f32 %v2353_v43, %v2848_v31 }
 0x2cf   :  { %v981_v26 = vpop.xlane.xlu1 %980 }
 0x2d0   :  { %v1010_v58 = vmul.f32 %v981_v26, %v2217_v2  ;;  %866 = vadd.xlane.f32.xlu1 %v849_v61  ;;  %1056 = vadd.xlane.f32.xlu0 %v1040_v39  ;;  %v1041_v62 = vand.u32 2147483647, %v1025_v45  ;;  %v834_v23 = vsub.f32 %v754_v59, %v818_v56  ;;  %v2851_v59 = vld [vmem:[#allocation37_spill] sm:$0xff]  ;;  %v2853_v61 = vld [vmem:[#allocation39_spill] sm:$0xff] }
 0x2d1   :  { %v791_v37 = vpop.xlane.xlu0 %790  ;;  %v757_v36 = vadd.f32 %v2357_v17, %v2851_v59 }
 0x2d2   :  { %v1026_v60 = vsub.f32 %v946_v19, %v1010_v58  ;;  %v819_v0 = vmul.f32 %v791_v37, %v2215_v1  ;;  %v850_v47 = vand.u32 2147483647, %v834_v23  ;;  %v2852_v19 = vld [vmem:[#allocation42_spill] sm:$0xff] }
 0x2d3   :  { %v983_v5 = vpop.xlane.xlu1 %982  ;;  %v949_v56 = vadd.f32 %v2361_v27, %v2852_v19  ;;  %v2864_v19 = vld [vmem:[#allocation54_spill] sm:$0xff] }
 0x2d4   :  { %v1011_v40 = vmul.f32 %v983_v5, %v2846_v35  ;;  %1058 = vadd.xlane.f32.xlu1 %v1041_v62  ;;  %868 = vadd.xlane.f32.xlu0 %v850_v47  ;;  %v1042_v2 = vand.u32 2147483647, %v1026_v60  ;;  %v835_v16 = vsub.f32 %v755_v20, %v819_v0  ;;  %v2854_v62 = vld [vmem:[#allocation44_spill] sm:$0xff]  ;;  %v2855_v60 = vld [vmem:[#allocation41_spill] sm:$0xff]  ;;  %v2856_v47 = vld [vmem:[#allocation46_spill] sm:$0xff] }
 0x2d5   :  { %v793_v46 = vpop.xlane.xlu0 %792  ;;  %v950_v5 = vadd.f32 %v2369_v34, %v2856_v47  ;;  %v2857_v35 = vld [vmem:[#allocation43_spill] sm:$0xff] }
 0x2d6   :  { %v1027_v63 = vsub.f32 %v947_v38, %v1011_v40  ;;  %v820_v4 = vmul.f32 %v793_v46, %v2849_v51  ;;  %v851_v30 = vand.u32 2147483647, %v835_v16  ;;  %v758_v38 = vadd.f32 %v2365_v13, %v2855_v60  ;;  %v2858_v16 = vld [vmem:[#allocation48_spill] sm:$0xff]  ;;  %v2860_v51 = vld [vmem:[#allocation50_spill] sm:$0xff]  ;;  %v2869_v47 = vld [vmem:[#allocation55_spill] sm:$0xff] }
 0x2d7   :  { %v985_v1 = vpop.xlane.xlu1 %984 }
 0x2d8   :  { %v1012_v57 = vmul.f32 %v985_v1, %v2850_v22  ;;  %1060 = vadd.xlane.f32.xlu1 %v1042_v2  ;;  %870 = vadd.xlane.f32.xlu0 %v851_v30  ;;  %v1043_v55 = vand.u32 2147483647, %v1027_v63  ;;  %v836_v39 = vsub.f32 %v756_v41, %v820_v4  ;;  %v2859_v63 = vld [vmem:[#allocation45_spill] sm:$0xff]  ;;  %v951_v4 = vadd.f32 %v2377_v12, %v2860_v51  ;;  %v2861_v30 = vld [vmem:[#allocation47_spill] sm:$0xff] }
 0x2d9   :  { %v795_v45 = vpop.xlane.xlu0 %794  ;;  %v759_v31 = vadd.f32 %v2373_v9, %v2859_v63  ;;  %v2872_v63 = vld [vmem:[#allocation62_spill] sm:$0xff] }
 0x2da   :  { %v1028_v42 = vsub.f32 %v948_v54, %v1012_v57  ;;  %v821_v43 = vmul.f32 %v795_v45, %v2853_v61  ;;  %v852_v26 = vand.u32 2147483647, %v836_v39  ;;  %v2862_v57 = vld [vmem:[#allocation52_spill] sm:$0xff]  ;;  %v2865_v61 = vld [vmem:[#allocation51_spill] sm:$0xff] }
 0x2db   :  { %v987_v58 = vpop.xlane.xlu1 %986 }
 0x2dc   :  { %v1013_v23 = vmul.f32 %v987_v58, %v2854_v62  ;;  %1062 = vadd.xlane.f32.xlu1 %v1043_v55  ;;  %872 = vadd.xlane.f32.xlu0 %v852_v26  ;;  %v1044_v20 = vand.u32 2147483647, %v1028_v42  ;;  %v837_v37 = vsub.f32 %v757_v36, %v821_v43  ;;  %v2863_v36 = vld [vmem:[#allocation49_spill] sm:$0xff]  ;;  %v2866_v58 = vld [vmem:[#allocation56_spill] sm:$0xff] }
 0x2dd   :  { %v797_v0 = vpop.xlane.xlu0 %796  ;;  %v760_v45 = vadd.f32 %v2381_v7, %v2863_v36  ;;  %v2877_v36 = vld [vmem:[#allocation63_spill] sm:$0xff] }
 0x2de   :  { %v1029_v17 = vsub.f32 %v949_v56, %v1013_v23  ;;  %v822_v27 = vmul.f32 %v797_v0, %v2857_v35  ;;  %v853_v40 = vand.u32 2147483647, %v837_v37  ;;  %v952_v56 = vadd.f32 %v2385_v8, %v2864_v19  ;;  %v2867_v37 = vld [vmem:[#allocation53_spill] sm:$0xff]  ;;  %v2868_v0 = vld [vmem:[#allocation58_spill] sm:$0xff] }
 0x2df   :  { %v989_v2 = vpop.xlane.xlu1 %988  ;;  %v761_v60 = vadd.f32 %v2389_v6, %v2867_v37 }
 0x2e0   :  { %v1014_v50 = vmul.f32 %v989_v2, %v2858_v16  ;;  %1064 = vadd.xlane.f32.xlu1 %v1044_v20  ;;  %874 = vadd.xlane.f32.xlu0 %v853_v40  ;;  %v1045_v41 = vand.u32 2147483647, %v1029_v17  ;;  %v838_v46 = vsub.f32 %v758_v38, %v822_v27  ;;  %v953_v17 = vadd.f32 %v2393_v3, %v2868_v0  ;;  %v2870_v27 = vld [vmem:[#allocation60_spill] sm:$0xff] }
 0x2e1   :  { %v799_v54 = vpop.xlane.xlu0 %798 }
 0x2e2   :  { %v1030_v13 = vsub.f32 %v950_v5, %v1014_v50  ;;  %v823_v34 = vmul.f32 %v799_v54, %v2861_v30  ;;  %v854_v1 = vand.u32 2147483647, %v838_v46  ;;  %v2871_v50 = vld [vmem:[#allocation57_spill] sm:$0xff]  ;;  %v2873_v54 = vld [vmem:[#allocation59_spill] sm:$0xff] }
 0x2e3   :  { %v991_v22 = vpop.xlane.xlu1 %990 }
 0x2e4   :  { %v1015_v55 = vmul.f32 %v991_v22, %v2862_v57  ;;  %1066 = vadd.xlane.f32.xlu1 %v1045_v41  ;;  %876 = vadd.xlane.f32.xlu0 %v854_v1  ;;  %v1046_v39 = vand.u32 2147483647, %v1030_v13  ;;  %v839_v59 = vsub.f32 %v759_v31, %v823_v34  ;;  %v762_v41 = vadd.f32 %v2397_v10, %v2871_v50  ;;  %v2875_v22 = vld [vmem:[#allocation61_spill] sm:$0xff] }
 0x2e5   :  { %v801_v42 = vpop.xlane.xlu0 %800  ;;  %v954_v31 = vadd.f32 %v2401_v11, %v2872_v63  ;;  %v763_v57 = vadd.f32 %v2405_v14, %v2875_v22  ;;  %v2886_v63 = vld [vmem:[#allocation75_spill] sm:$0xff] }
 0x2e6   :  { %v1031_v9 = vsub.f32 %v951_v4, %v1015_v55  ;;  %v824_v12 = vmul.f32 %v801_v42, %v2865_v61  ;;  %v855_v43 = vand.u32 2147483647, %v839_v59  ;;  %v2874_v4 = vld [vmem:[#allocation64_spill] sm:$0xff] }
 0x2e7   :  { %v993_v26 = vpop.xlane.xlu1 %992 }
 0x2e8   :  { %v1016_v62 = vmul.f32 %v993_v26, %v2866_v58  ;;  %1068 = vadd.xlane.f32.xlu1 %v1046_v39  ;;  %878 = vadd.xlane.f32.xlu0 %v855_v43  ;;  %v1047_v23 = vand.u32 2147483647, %v1031_v9  ;;  %v840_v20 = vsub.f32 %v760_v45, %v824_v12  ;;  %v2876_v39 = vld [vmem:[#allocation66_spill] sm:$0xff]  ;;  %v2878_v9 = vld [vmem:[#allocation68_spill] sm:$0xff]  ;;  %v2879_v12 = vld [vmem:[#allocation65_spill] sm:$0xff] }
 0x2e9   :  { %v803_v38 = vpop.xlane.xlu0 %802  ;;  %v955_v59 = vadd.f32 %v2409_v15, %v2876_v39  ;;  %v764_v43 = vadd.f32 %v2413_v18, %v2879_v12  ;;  %v2880_v58 = vld [vmem:[#allocation70_spill] sm:$0xff] }
 0x2ea   :  { %v1032_v7 = vsub.f32 %v952_v56, %v1016_v62  ;;  %v825_v8 = vmul.f32 %v803_v38, %v2869_v47  ;;  %v856_v5 = vand.u32 2147483647, %v840_v20  ;;  %v956_v62 = vadd.f32 %v2417_v21, %v2880_v58 }
 0x2eb   :  { %v995_v35 = vpop.xlane.xlu1 %994 }
 0x2ec   :  { %v1017_v40 = vmul.f32 %v995_v35, %v2870_v27  ;;  %1070 = vadd.xlane.f32.xlu1 %v1047_v23  ;;  %880 = vadd.xlane.f32.xlu0 %v856_v5  ;;  %v1048_v2 = vand.u32 2147483647, %v1032_v7  ;;  %v841_v16 = vsub.f32 %v761_v60, %v825_v8  ;;  %v2881_v23 = vld [vmem:[#allocation67_spill] sm:$0xff]  ;;  %v2884_v5 = vld [vmem:[#allocation73_spill] sm:$0xff] }
 0x2ed   :  { %v805_v46 = vpop.xlane.xlu0 %804  ;;  %v2882_v60 = vld [vmem:[#allocation71_spill] sm:$0xff]  ;;  %v957_v35 = vadd.f32 %v2425_v25, %v2884_v5 }
 0x2ee   :  { %v1033_v6 = vsub.f32 %v953_v17, %v1017_v40  ;;  %v826_v3 = vmul.f32 %v805_v46, %v2873_v54  ;;  %v857_v13 = vand.u32 2147483647, %v841_v16  ;;  %v2883_v17 = vld [vmem:[#allocation69_spill] sm:$0xff] }
 0x2ef   :  { %v997_v51 = vpop.xlane.xlu1 %996  ;;  %v765_v47 = vadd.f32 %v2421_v24, %v2883_v17 }
 0x2f0   :  { %v1018_v30 = vmul.f32 %v997_v51, %v2874_v4  ;;  %1072 = vadd.xlane.f32.xlu1 %v1048_v2  ;;  %882 = vadd.xlane.f32.xlu0 %v857_v13  ;;  %v1049_v34 = vand.u32 2147483647, %v1033_v6  ;;  %v842_v1 = vsub.f32 %v762_v41, %v826_v3  ;;  %v2885_v41 = vld [vmem:[#allocation72_spill] sm:$0xff]  ;;  %v2887_v51 = vld [vmem:[#allocation74_spill] sm:$0xff] }
 0x2f1   :  { %v807_v55 = vpop.xlane.xlu0 %806  ;;  %v766_v46 = vadd.f32 %v2429_v28, %v2885_v41  ;;  %v767_v4 = vadd.f32 %v2437_v32, %v2887_v51 }
 0x2f2   :  { %v1034_v10 = vsub.f32 %v954_v31, %v1018_v30  ;;  %v827_v11 = vmul.f32 %v807_v55, %v2877_v36  ;;  %v858_v45 = vand.u32 2147483647, %v842_v1  ;;  %v958_v31 = vadd.f32 %v2433_v29, %v2886_v63 }
 0x2f3   :  { %v999_v42 = vpop.xlane.xlu1 %998 }
 0x2f4   :  { %v1019_v19 = vmul.f32 %v999_v42, %v2878_v9  ;;  %1074 = vadd.xlane.f32.xlu1 %v1049_v34  ;;  %884 = vadd.xlane.f32.xlu0 %v858_v45  ;;  %v1050_v56 = vand.u32 2147483647, %v1034_v10  ;;  %v843_v61 = vsub.f32 %v763_v57, %v827_v11  ;;  %v2888_v34 = vld [vmem:[#allocation76_spill] sm:$0xff]  ;;  %v2889_v57 = vld [vmem:[#allocation77_spill] sm:$0xff] }
 0x2f5   :  { %v809_v26 = vpop.xlane.xlu0 %808  ;;  %v959_v1 = vadd.f32 %v2441_v33, %v2888_v34 }
 0x2f6   :  { %v1035_v14 = vsub.f32 %v955_v59, %v1019_v19  ;;  %v828_v15 = vmul.f32 %v809_v26, %v2881_v23  ;;  %v859_v20 = vand.u32 2147483647, %v843_v61 }
 0x2f7   :  { %v1001_v37 = vpop.xlane.xlu1 %1000 }
 0x2f8   :  { %v1020_v38 = vmul.f32 %v1001_v37, %v2882_v60  ;;  %1076 = vadd.xlane.f32.xlu1 %v1050_v56  ;;  %886 = vadd.xlane.f32.xlu0 %v859_v20  ;;  %v1051_v7 = vand.u32 2147483647, %v1035_v14  ;;  %v844_v0 = vsub.f32 %v764_v43, %v828_v15  ;;  %v2890_v15 = vlaneseq  ;;  %v2891_v37 = vld [vmem:[#allocation33_spill] sm:$0xff] }
 0x2f9   :  { %v811_v8 = vpop.xlane.xlu0 %810  ;;  %v1108_v60 = vadd.s32 4294967288, %v2891_v37  ;;  %v1122_v17 = vadd.s32 4294967272, %v2891_v37  ;;  %v1143_v5 = vadd.s32 4294967248, %v2891_v37  ;;  %v1164_v41 = vadd.s32 4294967224, %v2891_v37 }
 0x2fa   :  { %v1036_v18 = vsub.f32 %v956_v62, %v1020_v38  ;;  %v829_v21 = vmul.f32 %v811_v8, %v2295_v44  ;;  %v860_v27 = vand.u32 2147483647, %v844_v0  ;;  %v2578_v20 = vshrl.u32 %v2890_v15, 7 }
 0x2fb   :  { %v1003_v40 = vpop.xlane.xlu1 %1002  ;;  %v1115_v38 = vadd.s32 4294967280, %v2891_v37  ;;  %v1136_v8 = vadd.s32 4294967256, %v2891_v37  ;;  %v1199_v34 = vadd.s32 4294967184, %v2891_v37 }
 0x2fc   :  { %v1021_v2 = vmul.f32 %v1003_v40, %v2305_v49  ;;  %1078 = vadd.xlane.f32.xlu1 %v1051_v7  ;;  %888 = vadd.xlane.f32.xlu0 %v860_v27  ;;  %v1052_v16 = vand.u32 2147483647, %v1036_v18  ;;  %v845_v50 = vsub.f32 %v765_v47, %v829_v21  ;;  %v1129_v47 = vadd.s32 4294967264, %v2891_v37 }
 0x2fd   :  { %v813_v6 = vpop.xlane.xlu0 %812  ;;  %v2591_v18 = vsub.s32 %v2891_v37, %v2578_v20  ;;  %v2598_v21 = vsub.s32 %v1115_v38, %v2578_v20  ;;  %v1150_v27 = vadd.s32 4294967240, %v2891_v37  ;;  %v1157_v40 = vadd.s32 4294967232, %v2891_v37 }
 0x2fe   :  { %v1037_v24 = vsub.f32 %v957_v35, %v1021_v2  ;;  %v830_v25 = vmul.f32 %v813_v6, %v2303_v48  ;;  %v861_v54 = vand.u32 2147483647, %v845_v50  ;;  %v2595_v35 = vsub.s32 %v1108_v60, %v2578_v20 }
 0x2ff   :  { %v1005_v44 = vpop.xlane.xlu1 %1004  ;;  %v2607_v50 = vsub.s32 %v1122_v17, %v2578_v20  ;;  %v2614_v6 = vsub.s32 %v1136_v8, %v2578_v20  ;;  %v2618_v63 = vsub.s32 %v1143_v5, %v2578_v20  ;;  %v2635_v51 = vsub.s32 %v1164_v41, %v2578_v20 }
 0x300   :  { %v1022_v3 = vmul.f32 %v1005_v44, %v2313_v53  ;;  %1080 = vadd.xlane.f32.xlu1 %v1052_v16  ;;  %890 = vadd.xlane.f32.xlu0 %v861_v54  ;;  %v1053_v49 = vand.u32 2147483647, %v1037_v24  ;;  %v846_v13 = vsub.f32 %v766_v46, %v830_v25  ;;  %v2611_v46 = vsub.s32 %v1129_v47, %v2578_v20 }
 0x301   :  { %v815_v30 = vpop.xlane.xlu0 %814  ;;  %v1171_v24 = vadd.s32 4294967216, %v2891_v37  ;;  %v2622_v25 = vsub.s32 %v1150_v27, %v2578_v20  ;;  %v2625_v54 = vsub.s32 %v1157_v40, %v2578_v20 }
 0x302   :  { %v1038_v28 = vsub.f32 %v958_v31, %v1022_v3  ;;  %v831_v29 = vmul.f32 %v815_v30, %v2311_v52  ;;  %v862_v22 = vand.u32 2147483647, %v846_v13  ;;  %v1178_v31 = vadd.s32 4294967208, %v2891_v37 }
 0x303   :  { %v1007_v48 = vpop.xlane.xlu1 %1006 }
 0x304   :  { %v1023_v55 = vmul.f32 %v1007_v48, %v2889_v57  ;;  %1082 = vadd.xlane.f32.xlu1 %v1053_v49  ;;  %892 = vadd.xlane.f32.xlu0 %v862_v22  ;;  %v1054_v53 = vand.u32 2147483647, %v1038_v28  ;;  %v847_v10 = vsub.f32 %v767_v4, %v831_v29  ;;  %v1185_v49 = vadd.s32 4294967200, %v2891_v37 }
 0x305   :  { %v1192_v4 = vadd.s32 4294967192, %v2891_v37  ;;  %v2641_v28 = vsub.s32 %v1171_v24, %v2578_v20  ;;  %v2649_v22 = vsub.s32 %v1178_v31, %v2578_v20 }
 0x306   :  { %v1039_v39 = vsub.f32 %v959_v1, %v1023_v55  ;;  %v863_v59 = vand.u32 2147483647, %v847_v10  ;;  %v2656_v55 = vsub.s32 %v1185_v49, %v2578_v20  ;;  %v1206_v10 = vadd.s32 4294967176, %v2891_v37 }
 0x308   :  { %1084 = vadd.xlane.f32.xlu1 %v1054_v53  ;;  %894 = vadd.xlane.f32.xlu0 %v863_v59  ;;  %v1055_v32 = vand.u32 2147483647, %v1039_v39 }
 0x30c   :  { %1086 = vadd.xlane.f32.xlu1 %v1055_v32 }
 0x359   :  { %v2543_v36 = vpop.xlane.xlu0 %864 }
 0x35a   :  { %v1107_v1 = vrot.slane %v2543_v36, %v2591_v18  ;;  %v2665_v36 = vsub.s32 %v1192_v4, %v2578_v20 }
 0x35d   :  { %v2545_v11 = vpop.xlane.xlu1 %866  ;;  %v2547_v33 = vpop.xlane.xlu0 %1056 }
 0x35e   :  { %v1112_v13 = vrot.slane %v2545_v11, %v2595_v35 }
 0x360   :  { %v1114_v39 = vsel %vm1113_vm0, %v1112_v13, %v1107_v1 }
 0x361   :  { %v2549_v52 = vpop.xlane.xlu1 %1058  ;;  %v2551_v45 = vpop.xlane.xlu0 %868 }
 0x362   :  { %v1119_v30 = vrot.slane %v2551_v45, %v2598_v21  ;;  %v1238_v59 = vrot.slane %v2549_v52, %v2595_v35  ;;  %v1234_v52 = vrot.slane %v2547_v33, %v2591_v18  ;;  %v2688_v33 = vsub.s32 %v1206_v10, %v2578_v20 }
 0x364   :  { %v1121_v11 = vsel %vm1120_vm1, %v1119_v30, %v1114_v39  ;;  %v1239_v47 = vsel %vm1113_vm0, %v1238_v59, %v1234_v52 }
 0x365   :  { %v2553_v42 = vpop.xlane.xlu1 %1060  ;;  %v2555_v9 = vpop.xlane.xlu0 %870 }
 0x366   :  { %v1126_v29 = vrot.slane %v2555_v9, %v2607_v50  ;;  %v1243_v45 = vrot.slane %v2553_v42, %v2598_v21 }
 0x369   :  { %v2557_v19 = vpop.xlane.xlu1 %1062  ;;  %v2559_v56 = vpop.xlane.xlu0 %872 }
 0x36a   :  { %v1133_v48 = vrot.slane %v2559_v56, %v2611_v46  ;;  %v2673_v56 = vsub.s32 %v1199_v34, %v2578_v20  ;;  %v1248_v15 = vrot.slane %v2557_v19, %v2607_v50 }
 0x36d   :  { %v2561_v61 = vpop.xlane.xlu1 %1064  ;;  %v2563_v12 = vpop.xlane.xlu0 %874 }
 0x36e   :  { %v1140_v32 = vrot.slane %v2563_v12, %v2614_v6  ;;  %v1128_v12 = vsel %vm1127_vm2, %v1126_v29, %v1121_v11 }
 0x36f   :  { %v1135_v42 = vsel %vm1134_vm3, %v1133_v48, %v1128_v12 }
 0x370   :  { %v1142_v19 = vsel %vm1141_vm4, %v1140_v32, %v1135_v42 }
 0x371   :  { %v2565_v43 = vpop.xlane.xlu1 %1066  ;;  %v2567_v26 = vpop.xlane.xlu0 %876 }
 0x372   :  { %v1147_v9 = vrot.slane %v2567_v26, %v2618_v63  ;;  %v1253_v26 = vrot.slane %v2561_v61, %v2611_v46  ;;  %v1244_v61 = vsel %vm1120_vm1, %v1243_v45, %v1239_v47 }
 0x373   :  { %v1249_v5 = vsel %vm1127_vm2, %v1248_v15, %v1244_v61 }
 0x374   :  { %v1149_v18 = vsel %vm1148_vm5, %v1147_v9, %v1142_v19  ;;  %v1254_v21 = vsel %vm1134_vm3, %v1253_v26, %v1249_v5 }
 0x375   :  { %v2569_v14 = vpop.xlane.xlu1 %1068  ;;  %v2571_v58 = vpop.xlane.xlu0 %878 }
 0x376   :  { %v1154_v37 = vrot.slane %v2571_v58, %v2622_v25  ;;  %v1258_v58 = vrot.slane %v2565_v43, %v2614_v6 }
 0x378   :  { %v1156_v35 = vsel %vm1155_vm6, %v1154_v37, %v1149_v18  ;;  %v1259_v41 = vsel %vm1141_vm4, %v1258_v58, %v1254_v21 }
 0x379   :  { %v2573_v62 = vpop.xlane.xlu1 %1070  ;;  %v2575_v23 = vpop.xlane.xlu0 %880 }
 0x37a   :  { %v1161_v60 = vrot.slane %v2575_v23, %v2625_v54  ;;  %v1263_v23 = vrot.slane %v2569_v14, %v2618_v63  ;;  %v1268_v43 = vrot.slane %v2573_v62, %v2622_v25 }
 0x37c   :  { %v1163_v27 = vsel %vm1162_vm7, %v1161_v60, %v1156_v35  ;;  %v1264_v24 = vsel %vm1148_vm5, %v1263_v23, %v1259_v41 }
 0x37d   :  { %v2582_v7 = vpop.xlane.xlu1 %1072  ;;  %v2584_v0 = vpop.xlane.xlu0 %882  ;;  %v1269_v25 = vsel %vm1155_vm6, %v1268_v43, %v1264_v24 }
 0x37e   :  { %v1168_v8 = vrot.slane %v2584_v0, %v2635_v51  ;;  %v1273_v14 = vrot.slane %v2582_v7, %v2625_v54 }
 0x380   :  { %v1170_v46 = vsel %vm1169_vm8, %v1168_v8, %v1163_v27 }
 0x381   :  { %v2602_v2 = vpop.xlane.xlu1 %1074  ;;  %v2604_v16 = vpop.xlane.xlu0 %884 }
 0x382   :  { %v1175_v20 = vrot.slane %v2604_v16, %v2641_v28  ;;  %v1278_v62 = vrot.slane %v2602_v2, %v2635_v51  ;;  %v1274_v2 = vsel %vm1162_vm7, %v1273_v14, %v1269_v25 }
 0x384   :  { %v1177_v63 = vsel %vm1176_vm9, %v1175_v20, %v1170_v46  ;;  %v1279_v4 = vsel %vm1169_vm8, %v1278_v62, %v1274_v2 }
 0x385   :  { %v2627_v44 = vpop.xlane.xlu1 %1076  ;;  %v2629_v3 = vpop.xlane.xlu0 %886 }
 0x386   :  { %v1182_v0 = vrot.slane %v2629_v3, %v2649_v22  ;;  %v1283_v7 = vrot.slane %v2627_v44, %v2641_v28 }
 0x388   :  { %v1184_v54 = vsel %vm1183_vm10, %v1182_v0, %v1177_v63  ;;  %v1284_v1 = vsel %vm1176_vm9, %v1283_v7, %v1279_v4 }
 0x389   :  { %v2653_v57 = vpop.xlane.xlu1 %1078  ;;  %v889_v53 = vpop.xlane.xlu0 %888 }
 0x38a   :  { %v1189_v40 = vrot.slane %v889_v53, %v2656_v55  ;;  %v1288_v3 = vrot.slane %v2653_v57, %v2649_v22 }
 0x38c   :  { %v1191_v49 = vsel %vm1190_vm11, %v1189_v40, %v1184_v54  ;;  %v1289_v48 = vsel %vm1183_vm10, %v1288_v3, %v1284_v1 }
 0x38d   :  { %v1081_v38 = vpop.xlane.xlu1 %1080  ;;  %v891_v17 = vpop.xlane.xlu0 %890 }
 0x38e   :  { %v1196_v6 = vrot.slane %v891_v17, %v2665_v36  ;;  %v1293_v13 = vrot.slane %v1081_v38, %v2656_v55 }
 0x390   :  { %v1198_v30 = vsel %vm1197_vm12, %v1196_v6, %v1191_v49  ;;  %v1294_v55 = vsel %vm1190_vm11, %v1293_v13, %v1289_v48 }
 0x391   :  { %v1083_v16 = vpop.xlane.xlu1 %1082  ;;  %v893_v50 = vpop.xlane.xlu0 %892 }
 0x392   :  { %v1203_v31 = vrot.slane %v893_v50, %v2673_v56  ;;  %v1298_v28 = vrot.slane %v1083_v16, %v2665_v36 }
 0x394   :  { %v1205_v22 = vsel %vm1204_vm13, %v1203_v31, %v1198_v30  ;;  %v1299_v10 = vsel %vm1197_vm12, %v1298_v28, %v1294_v55 }
 0x395   :  { %v1085_v51 = vpop.xlane.xlu1 %1084  ;;  %v895_v44 = vpop.xlane.xlu0 %894 }
 0x396   :  { %v1210_v34 = vrot.slane %v895_v44, %v2688_v33  ;;  %v1303_v29 = vrot.slane %v1085_v51, %v2673_v56 }
 0x398   :  { %v1212_v57 = vsel %vm1211_vm14, %v1210_v34, %v1205_v22 }
 0x399   :  { %v1087_v53 = vpop.xlane.xlu1 %1086  ;;  %1214 = vst [vmem:[#allocation12] sm:$0x1] %v1212_v57 }
 0x39a   :  { %v1308_v39 = vrot.slane %v1087_v53, %v2688_v33 }
 0x39b   :  { %1694 = shalt.err (!%p1691_p3)
}
 0x39c   :  { %s1695_s20 = scalar_lea.hbm %s2773_s8, 16 }
 0x39d   :  { %p1696_p4 = scmp.ne.s32.totalorder %s2773_s8, %s1695_s20  ;;  %p1699_p5 = scmp.lt.u32.totalorder %s1695_s20, %s2773_s8 }
 0x39f   :  { %p1701_p6 = pnand %p1699_p5, %p1696_p4 }
 0x3a1   :  { %1704 = shalt.err (!%p1701_p6)
}
 0x3a2   :  { %1321 = dma.vmem_to_hbm [thread:$0]  %s1319_s7, 16, %s2773_s8, [#allocation13]   ;;  %v1304_v59 = vsel %vm1204_vm13, %v1303_v29, %v1299_v10 }
 0x3a3   :  { %v1309_v32 = vsel %vm1211_vm14, %v1308_v39, %v1304_v59  ;;  %s1705_s25 = scalar_lea.vmem %s1329_s1, 16  ;;  %s1709_s10 = scalar_lea.vmem %s1329_s1, 32 }
 0x3a4   :  { %1311 = vst [vmem:[#allocation14] sm:$0x1] %v1309_v32  ;;  %p1706_p7 = scmp.ne.s32.totalorder %s1329_s1, %s1705_s25  ;;  %p1710_p8 = scmp.lt.s32.totalorder %s1329_s1, %s1329_s1 }
 0x3a5   :  { %p1711_p9 = scmp.lt.s32.totalorder %s1709_s10, %s1705_s25 }
 0x3a7   :  { %p1712_p10 = por %p1711_p9, %p1710_p8 }
 0x3a9   :  { %p1713_p11 = pnand %p1712_p10, %p1706_p7 }
 0x3ab   :  { %1716 = shalt.err (!%p1713_p11)
}
 0x3ac   :  { %s1717_s14 = scalar_lea.hbm %s2774_s9, 16 }
 0x3ad   :  { %p1718_p12 = scmp.ne.s32.totalorder %s2774_s9, %s1717_s14  ;;  %p1721_p13 = scmp.lt.u32.totalorder %s1717_s14, %s2774_s9 }
 0x3af   :  { %p1723_p0 = pnand %p1721_p13, %p1718_p12 }
 0x3b1   :  { %1726 = shalt.err (!%p1723_p0)
}
 0x3b2   :  { %1331 = dma.vmem_to_hbm [thread:$0]  %s1329_s1, 16, %s2774_s9, [#allocation15]  }
 0x3b3   :  { %1741 = dma.done.wait [#allocation13], 16  }
 0x3b4   :  { %1742 = vsyncadd [#allocation13], 4294967280 }
 0x3b5   :  { %1743 = dma.done.wait [#allocation15], 16  }
 0x3b6   :  { %1744 = vsyncadd [#allocation15], 4294967280 }
 0x3b7   :  { %1338 = vsyncpa [#allocation13], 1 }
 0x3b8   :  { %1339 = vsyncpa [#allocation15], 1 }
 0x3b9   :  { %1340 = vsyncmov [#allocation6] }
 0x3bc   :  { %s1341_s16 = vpop.sfrf %1340 }
 0x3bd   :  { %p1452_p1 = scmp.ne.s32.totalorder %s1341_s16, 0 }
 0x3bf   :  { %1345 = shalt.err (%p1452_p1)  }
 0x3c0   :  { %1347 = vsyncmov [#allocation6 + $0x1] }
 0x3c3   :  { %s1348_s17 = vpop.sfrf %1347 }
 0x3c4   :  { %p1453_p2 = scmp.ne.s32.totalorder %s1348_s17, 0 }
 0x3c6   :  { %1352 = shalt.err (%p1453_p2)  }
 0x3c7   :  { %1354 = vsyncmov [#allocation6 + $0x2] }
 0x3ca   :  { %s1355_s28 = vpop.sfrf %1354 }
 0x3cb   :  { %p1454_p3 = scmp.ne.s32.totalorder %s1355_s28, 0 }
 0x3cd   :  { %1359 = shalt.err (%p1454_p3)  }
 0x3ce   :  { %1361 = vsyncmov [#allocation6 + $0x3] }
 0x3d1   :  { %s1362_s9 = vpop.sfrf %1361 }
 0x3d2   :  { %p1455_p4 = scmp.ne.s32.totalorder %s1362_s9, 0 }
 0x3d4   :  { %1366 = shalt.err (%p1455_p4)  }

</bundles_post_ra>
